<compile_context>
chip_gen: v7x
topology: tpu7x:2x2x1
jax: 0.10.0
libtpu: 0.0.40
codegen_flags: <defaults>
</compile_context>

<pallas_src>
import math
from functools import partial

import jax
import jax.numpy as jnp
from jax.experimental import pallas as pl
from jax.experimental.pallas import tpu as pltpu


# ---------------------------------------------------------------------------
# Fused kernel: pos-enc + nlayers encoder layers + last-token decoder
# ---------------------------------------------------------------------------
def fused_transformer_kernel(nhead, nlayers,
                             x_ref, pe_ref, mask_ref,
                             wqkv_ref, bqkv_ref, wo_ref, bo_ref,
                             ln1w_ref, ln1b_ref,
                             w1_ref, b1_ref, w2_ref, b2_ref,
                             ln2w_ref, ln2b_ref,
                             dw_ref, db_ref, o_ref):
    B, S, D = x_ref.shape
    dh = D // nhead
    eps = 1e-5
    f32 = jnp.float32

    def layer_norm(v, w, b):
        mu = jnp.mean(v, axis=-1, keepdims=True)
        var = jnp.mean((v - mu) ** 2, axis=-1, keepdims=True)
        return (v - mu) * jax.lax.rsqrt(var + eps) * w + b

    def softmax_last(s):
        s = s - jnp.max(s, axis=-1, keepdims=True)
        p = jnp.exp(s)
        return p * pl.reciprocal(jnp.sum(p, axis=-1, keepdims=True), approx=True)

    def load_layer(l):
        return (wqkv_ref[l], bqkv_ref[l], wo_ref[l], bo_ref[l],
                ln1w_ref[l], ln1b_ref[l], w1_ref[l], b1_ref[l],
                w2_ref[l], b2_ref[l], ln2w_ref[l], ln2b_ref[l])

    # positional encoding (dropout = identity in eval mode)
    x = x_ref[...] + pe_ref[...][None, :, :]          # (B, S, D)
    mask = mask_ref[...]                              # (S, S) additive causal

    # --- layers 0 .. nlayers-2: full sequence -------------------------------
    for l in range(nlayers - 1):
        (wqkv, bqkv, wo, bo, ln1w, ln1b,
         w1, b1, w2, b2, ln2w, ln2b) = load_layer(l)

        xf = x.reshape(B * S, D)
        # QKV projection, batched over B*S rows; q columns are pre-scaled.
        qkv = (jnp.dot(xf, wqkv, preferred_element_type=f32)
               + bqkv).reshape(B, S, 3 * D)

        heads = []
        for h in range(nhead):                         # static unroll (nhead small)
            qh = qkv[:, :, h * dh:(h + 1) * dh]                   # (B, S, dh)
            kh = qkv[:, :, D + h * dh:D + (h + 1) * dh]           # (B, S, dh)
            vh = qkv[:, :, 2 * D + h * dh:2 * D + (h + 1) * dh]   # (B, S, dh)
            s = jnp.einsum('bqd,bkd->bqk', qh, kh,
                           preferred_element_type=f32) + mask     # (B, S, S)
            p = softmax_last(s)
            heads.append(jnp.einsum('bqk,bkd->bqd', p, vh,
                                    preferred_element_type=f32))  # (B, S, dh)
        attn = jnp.concatenate(heads, axis=-1).reshape(B * S, D)
        attn = jnp.dot(attn, wo, preferred_element_type=f32) + bo

        h1 = layer_norm(xf + attn, ln1w, ln1b)                    # (B*S, D)
        ff = jnp.maximum(jnp.dot(h1, w1, preferred_element_type=f32) + b1, 0.0)
        ff = jnp.dot(ff, w2, preferred_element_type=f32) + b2
        x = layer_norm(h1 + ff, ln2w, ln2b).reshape(B, S, D)

    # --- last layer: only the final time step feeds the decoder -------------
    (wqkv, bqkv, wo, bo, ln1w, ln1b,
     w1, b1, w2, b2, ln2w, ln2b) = load_layer(nlayers - 1)

    xf = x.reshape(B * S, D)
    qkv = (jnp.dot(xf, wqkv, preferred_element_type=f32)
           + bqkv).reshape(B, S, 3 * D)

    heads = []
    for h in range(nhead):
        qh = qkv[:, S - 1:S, h * dh:(h + 1) * dh]                 # (B, 1, dh)
        kh = qkv[:, :, D + h * dh:D + (h + 1) * dh]               # (B, S, dh)
        vh = qkv[:, :, 2 * D + h * dh:2 * D + (h + 1) * dh]
        # causal-mask row S-1 is all zeros -> no mask add needed
        s = jnp.einsum('bqd,bkd->bqk', qh, kh,
                       preferred_element_type=f32)                # (B, 1, S)
        p = softmax_last(s)
        heads.append(jnp.einsum('bqk,bkd->bqd', p, vh,
                                preferred_element_type=f32))      # (B, 1, dh)
    attn = jnp.concatenate(heads, axis=-1).reshape(B, D)
    attn = jnp.dot(attn, wo, preferred_element_type=f32) + bo     # (B, D)

    x_last = x[:, S - 1, :]                                       # (B, D)
    h1 = layer_norm(x_last + attn, ln1w, ln1b)
    ff = jnp.maximum(jnp.dot(h1, w1, preferred_element_type=f32) + b1, 0.0)
    ff = jnp.dot(ff, w2, preferred_element_type=f32) + b2
    h2 = layer_norm(h1 + ff, ln2w, ln2b)                          # (B, D)

    # fused decoder: (B, D) @ (D, 1) + b ; write lane-dense (B, 128) slab
    dec = jnp.dot(h2, dw_ref[...], preferred_element_type=f32) + db_ref[...]
    o_ref[...] = jnp.broadcast_to(dec, o_ref.shape)


# ---------------------------------------------------------------------------
# Wrapper (jitted): layout transpose + single pallas_call + output slice
# ---------------------------------------------------------------------------
def build_forward(nhead, nlayers):
    kernel = partial(fused_transformer_kernel, nhead, nlayers)

    @jax.jit
    def forward(src, src_mask, pe, params, dec_w, dec_b):
        S, B, D = src.shape
        x_bsd = jnp.transpose(src, (1, 0, 2))         # (B, S, D) for the kernel
        operands = (x_bsd, pe, src_mask,
                    params["wqkv"], params["bqkv"], params["wo"], params["bo"],
                    params["ln1w"], params["ln1b"],
                    params["w1"], params["b1"], params["w2"], params["b2"],
                    params["ln2w"], params["ln2b"],
                    dec_w, dec_b)
        out_padded = pl.pallas_call(
            kernel,
            out_shape=jax.ShapeDtypeStruct((B, 128), jnp.float32),
            in_specs=[pl.BlockSpec(memory_space=pltpu.MemorySpace.VMEM)
                      for _ in range(len(operands))],
            out_specs=pl.BlockSpec(memory_space=pltpu.MemorySpace.VMEM),
        )(*operands)
        return out_padded[:, :1]                      # (B, 1)

    return forward


# ---------------------------------------------------------------------------
# Constants / parameter construction & host-side preparation
# ---------------------------------------------------------------------------
def make_positional_encoding(seq_len, d_model):
    position = jnp.arange(seq_len, dtype=jnp.float32)[:, None]
    div_term = jnp.exp(jnp.arange(0, d_model, 2, dtype=jnp.float32)
                       * (-math.log(10000.0) / d_model))
    pe = jnp.zeros((seq_len, d_model), dtype=jnp.float32)
    pe = pe.at[:, 0::2].set(jnp.sin(position * div_term))
    pe = pe.at[:, 1::2].set(jnp.cos(position * div_term))
    return pe                                          # (S, D)


def generate_square_subsequent_mask(sz):
    idx = jnp.arange(sz)
    return jnp.where(idx[None, :] <= idx[:, None], 0.0, -jnp.inf).astype(jnp.float32)


def init_params(key, ninp, nhead, nhid, nlayers):
    """PyTorch-convention parameters: Linear weights are (out_features, in_features)."""
    def uni(k, shape, scale=0.1):
        return jax.random.uniform(k, shape, jnp.float32, -scale, scale)

    layers = []
    for l in range(nlayers):
        ks = jax.random.split(jax.random.fold_in(key, l), 4)
        layers.append(dict(
            wqkv=uni(ks[0], (3 * ninp, ninp)),
            bqkv=jnp.zeros((1, 3 * ninp), jnp.float32),
            wo=uni(ks[1], (ninp, ninp)),
            bo=jnp.zeros((1, ninp), jnp.float32),
            ln1w=jnp.ones((1, ninp), jnp.float32),
            ln1b=jnp.zeros((1, ninp), jnp.float32),
            w1=uni(ks[2], (nhid, ninp)),
            b1=jnp.zeros((1, nhid), jnp.float32),
            w2=uni(ks[3], (ninp, nhid)),
            b2=jnp.zeros((1, ninp), jnp.float32),
            ln2w=jnp.ones((1, ninp), jnp.float32),
            ln2b=jnp.zeros((1, ninp), jnp.float32),
        ))
    # decoder: init_weights() -> weight U(-0.1, 0.1), bias = 0
    dec_w = uni(jax.random.fold_in(key, 12345), (1, ninp))
    dec_b = jnp.zeros((1, 1), jnp.float32)
    return layers, dec_w, dec_b


def prepare_params(layers, dec_w, dec_b, nhead):
    """One-time host prep: pre-transpose weights to (in, out), fold the
    1/sqrt(dh) attention scale into Wq/bq, stack layers along a leading axis."""
    D = layers[0]["wqkv"].shape[1]
    scale = 1.0 / math.sqrt(D // nhead)

    def prep_wqkv(w):                      # (3D, D) -> (D, 3D), q cols pre-scaled
        wt = w.T
        return jnp.concatenate([wt[:, :D] * scale, wt[:, D:]], axis=1)

    def prep_bqkv(b):                      # (1, 3D), q part pre-scaled
        return jnp.concatenate([b[:, :D] * scale, b[:, D:]], axis=1)

    def stack(key, fn=lambda a: a):
        return jnp.stack([fn(p[key]) for p in layers])

    params = dict(
        wqkv=stack("wqkv", prep_wqkv),     # (L, D, 3D)
        bqkv=stack("bqkv", prep_bqkv),     # (L, 1, 3D)
        wo=stack("wo", lambda w: w.T),     # (L, D, D)
        bo=stack("bo"),                    # (L, 1, D)
        ln1w=stack("ln1w"), ln1b=stack("ln1b"),
        w1=stack("w1", lambda w: w.T),     # (L, D, H)
        b1=stack("b1"),                    # (L, 1, H)
        w2=stack("w2", lambda w: w.T),     # (L, H, D)
        b2=stack("b2"),                    # (L, 1, D)
        ln2w=stack("ln2w"), ln2b=stack("ln2b"),
    )
    return params, dec_w.T, dec_b          # dec_w: (1, D) -> (D, 1)


# ---------------------------------------------------------------------------
if __name__ == "__main__":
    S, B = 8, 2
    ninp, nhead, nhid, nlayers = 32, 4, 64, 2

    key = jax.random.PRNGKey(0)
    k_src, k_par = jax.random.split(key)
    src = jax.random.normal(k_src, (S, B, ninp), dtype=jnp.float32)

    # hoisted constants (computed once, not per call)
    src_mask = generate_square_subsequent_mask(S)
    pe = make_positional_encoding(S, ninp)

    layers, dec_w, dec_b = init_params(k_par, ninp, nhead, nhid, nlayers)
    params, dec_w_t, dec_b_t = prepare_params(layers, dec_w, dec_b, nhead)

    forward = build_forward(nhead, nlayers)
    out = forward(src, src_mask, pe, params, dec_w_t, dec_b_t)
    out = jax.block_until_ready(out)

    assert out.shape == (B, 1) and out.dtype == jnp.float32
    assert bool(jnp.all(jnp.isfinite(out)))
    print("KERNEL_OK")
</pallas_src>

<mosaic_0001>
module attributes {stable_mosaic.version = 11 : i64} {
  func.func @fused_transformer_kernel(%arg0: memref<2x8x32xf32, #tpu.memory_space<vmem>>, %arg1: memref<8x32xf32, #tpu.memory_space<vmem>>, %arg2: memref<8x8xf32, #tpu.memory_space<vmem>>, %arg3: memref<2x32x96xf32, #tpu.memory_space<vmem>>, %arg4: memref<2x1x96xf32, #tpu.memory_space<vmem>>, %arg5: memref<2x32x32xf32, #tpu.memory_space<vmem>>, %arg6: memref<2x1x32xf32, #tpu.memory_space<vmem>>, %arg7: memref<2x1x32xf32, #tpu.memory_space<vmem>>, %arg8: memref<2x1x32xf32, #tpu.memory_space<vmem>>, %arg9: memref<2x32x64xf32, #tpu.memory_space<vmem>>, %arg10: memref<2x1x64xf32, #tpu.memory_space<vmem>>, %arg11: memref<2x64x32xf32, #tpu.memory_space<vmem>>, %arg12: memref<2x1x32xf32, #tpu.memory_space<vmem>>, %arg13: memref<2x1x32xf32, #tpu.memory_space<vmem>>, %arg14: memref<2x1x32xf32, #tpu.memory_space<vmem>>, %arg15: memref<32x1xf32, #tpu.memory_space<vmem>>, %arg16: memref<1x1xf32, #tpu.memory_space<vmem>>, %arg17: memref<2x128xf32, #tpu.memory_space<vmem>>) attributes {dimension_semantics = [], scalar_prefetch = 0 : i64, scratch_operands = 0 : i64, tpu.core_type = #tpu.core_type<tc>} {
    %c0 = arith.constant 0 : index
    %c0_0 = arith.constant 0 : index
    %c0_1 = arith.constant 0 : index
    %0 = vector.load %arg0[%c0, %c0_0, %c0_1] : memref<2x8x32xf32, #tpu.memory_space<vmem>>, vector<2x8x32xf32>
    %c0_2 = arith.constant 0 : index
    %c0_3 = arith.constant 0 : index
    %1 = vector.load %arg1[%c0_2, %c0_3] : memref<8x32xf32, #tpu.memory_space<vmem>>, vector<8x32xf32>
    %2 = vector.shape_cast %1 : vector<8x32xf32> to vector<1x8x32xf32>
    %3 = vector.broadcast %2 : vector<1x8x32xf32> to vector<2x8x32xf32>
    %4 = arith.addf %0, %3 : vector<2x8x32xf32>
    %c0_4 = arith.constant 0 : index
    %c0_5 = arith.constant 0 : index
    %5 = vector.load %arg2[%c0_4, %c0_5] : memref<8x8xf32, #tpu.memory_space<vmem>>, vector<8x8xf32>
    %c0_6 = arith.constant 0 : index
    %c0_7 = arith.constant 0 : index
    %c0_8 = arith.constant 0 : index
    %6 = vector.load %arg3[%c0_6, %c0_7, %c0_8] : memref<2x32x96xf32, #tpu.memory_space<vmem>>, vector<1x32x96xf32>
    %7 = vector.shape_cast %6 : vector<1x32x96xf32> to vector<32x96xf32>
    %c0_9 = arith.constant 0 : index
    %c0_10 = arith.constant 0 : index
    %c0_11 = arith.constant 0 : index
    %8 = vector.load %arg4[%c0_9, %c0_10, %c0_11] : memref<2x1x96xf32, #tpu.memory_space<vmem>>, vector<1x1x96xf32>
    %9 = vector.shape_cast %8 : vector<1x1x96xf32> to vector<1x96xf32>
    %c0_12 = arith.constant 0 : index
    %c0_13 = arith.constant 0 : index
    %c0_14 = arith.constant 0 : index
    %10 = vector.load %arg5[%c0_12, %c0_13, %c0_14] : memref<2x32x32xf32, #tpu.memory_space<vmem>>, vector<1x32x32xf32>
    %11 = vector.shape_cast %10 : vector<1x32x32xf32> to vector<32x32xf32>
    %c0_15 = arith.constant 0 : index
    %c0_16 = arith.constant 0 : index
    %c0_17 = arith.constant 0 : index
    %12 = vector.load %arg6[%c0_15, %c0_16, %c0_17] : memref<2x1x32xf32, #tpu.memory_space<vmem>>, vector<1x1x32xf32>
    %13 = vector.shape_cast %12 : vector<1x1x32xf32> to vector<1x32xf32>
    %c0_18 = arith.constant 0 : index
    %c0_19 = arith.constant 0 : index
    %c0_20 = arith.constant 0 : index
    %14 = vector.load %arg7[%c0_18, %c0_19, %c0_20] : memref<2x1x32xf32, #tpu.memory_space<vmem>>, vector<1x1x32xf32>
    %15 = vector.shape_cast %14 : vector<1x1x32xf32> to vector<1x32xf32>
    %c0_21 = arith.constant 0 : index
    %c0_22 = arith.constant 0 : index
    %c0_23 = arith.constant 0 : index
    %16 = vector.load %arg8[%c0_21, %c0_22, %c0_23] : memref<2x1x32xf32, #tpu.memory_space<vmem>>, vector<1x1x32xf32>
    %17 = vector.shape_cast %16 : vector<1x1x32xf32> to vector<1x32xf32>
    %c0_24 = arith.constant 0 : index
    %c0_25 = arith.constant 0 : index
    %c0_26 = arith.constant 0 : index
    %18 = vector.load %arg9[%c0_24, %c0_25, %c0_26] : memref<2x32x64xf32, #tpu.memory_space<vmem>>, vector<1x32x64xf32>
    %19 = vector.shape_cast %18 : vector<1x32x64xf32> to vector<32x64xf32>
    %c0_27 = arith.constant 0 : index
    %c0_28 = arith.constant 0 : index
    %c0_29 = arith.constant 0 : index
    %20 = vector.load %arg10[%c0_27, %c0_28, %c0_29] : memref<2x1x64xf32, #tpu.memory_space<vmem>>, vector<1x1x64xf32>
    %21 = vector.shape_cast %20 : vector<1x1x64xf32> to vector<1x64xf32>
    %c0_30 = arith.constant 0 : index
    %c0_31 = arith.constant 0 : index
    %c0_32 = arith.constant 0 : index
    %22 = vector.load %arg11[%c0_30, %c0_31, %c0_32] : memref<2x64x32xf32, #tpu.memory_space<vmem>>, vector<1x64x32xf32>
    %23 = vector.shape_cast %22 : vector<1x64x32xf32> to vector<64x32xf32>
    %c0_33 = arith.constant 0 : index
    %c0_34 = arith.constant 0 : index
    %c0_35 = arith.constant 0 : index
    %24 = vector.load %arg12[%c0_33, %c0_34, %c0_35] : memref<2x1x32xf32, #tpu.memory_space<vmem>>, vector<1x1x32xf32>
    %25 = vector.shape_cast %24 : vector<1x1x32xf32> to vector<1x32xf32>
    %c0_36 = arith.constant 0 : index
    %c0_37 = arith.constant 0 : index
    %c0_38 = arith.constant 0 : index
    %26 = vector.load %arg13[%c0_36, %c0_37, %c0_38] : memref<2x1x32xf32, #tpu.memory_space<vmem>>, vector<1x1x32xf32>
    %27 = vector.shape_cast %26 : vector<1x1x32xf32> to vector<1x32xf32>
    %c0_39 = arith.constant 0 : index
    %c0_40 = arith.constant 0 : index
    %c0_41 = arith.constant 0 : index
    %28 = vector.load %arg14[%c0_39, %c0_40, %c0_41] : memref<2x1x32xf32, #tpu.memory_space<vmem>>, vector<1x1x32xf32>
    %29 = vector.shape_cast %28 : vector<1x1x32xf32> to vector<1x32xf32>
    %30 = vector.shape_cast %4 : vector<2x8x32xf32> to vector<16x32xf32>
    %cst = arith.constant dense<0.000000e+00> : vector<16x96xf32>
    %31 = tpu.matmul %30, %7, %cst {dimension_numbers = #tpu.dot_dimension_numbers<[1], [0], [0], [1], [0, 0, 1, 1], [], []>} : vector<16x32xf32>, vector<32x96xf32>, vector<16x96xf32> -> vector<16x96xf32>
    %32 = vector.broadcast %9 : vector<1x96xf32> to vector<16x96xf32>
    %33 = arith.addf %31, %32 : vector<16x96xf32>
    %34 = vector.shape_cast %33 : vector<16x96xf32> to vector<2x8x96xf32>
    %35 = vector.extract_strided_slice %34 {offsets = [0, 0, 0], sizes = [2, 8, 8], strides = [1, 1, 1]} : vector<2x8x96xf32> to vector<2x8x8xf32>
    %36 = vector.extract_strided_slice %34 {offsets = [0, 0, 32], sizes = [2, 8, 8], strides = [1, 1, 1]} : vector<2x8x96xf32> to vector<2x8x8xf32>
    %37 = vector.extract_strided_slice %34 {offsets = [0, 0, 64], sizes = [2, 8, 8], strides = [1, 1, 1]} : vector<2x8x96xf32> to vector<2x8x8xf32>
    "tpu.trace_start"() <{level = 10 : i32, message = "bqd,bkd->bqk"}> : () -> ()
    %cst_42 = arith.constant dense<0.000000e+00> : vector<2x8x8xf32>
    %38 = tpu.matmul %35, %36, %cst_42 {dimension_numbers = #tpu.dot_dimension_numbers<[2], [2], [1], [1], [0, 0, 0, 1, 1, 1], [0], [0]>} : vector<2x8x8xf32>, vector<2x8x8xf32>, vector<2x8x8xf32> -> vector<2x8x8xf32>
    "tpu.trace_stop"() : () -> ()
    %39 = vector.shape_cast %5 : vector<8x8xf32> to vector<1x8x8xf32>
    %40 = vector.broadcast %39 : vector<1x8x8xf32> to vector<2x8x8xf32>
    %41 = arith.addf %38, %40 : vector<2x8x8xf32>
    %cst_43 = arith.constant dense<0xFF800000> : vector<2x8xf32>
    %42 = vector.multi_reduction <maximumf>, %41, %cst_43 [2] : vector<2x8x8xf32> to vector<2x8xf32>
    %43 = vector.shape_cast %42 : vector<2x8xf32> to vector<2x8x1xf32>
    %44 = vector.broadcast %43 : vector<2x8x1xf32> to vector<2x8x8xf32>
    %45 = arith.subf %41, %44 : vector<2x8x8xf32>
    %46 = math.exp %45 : vector<2x8x8xf32>
    %cst_44 = arith.constant dense<0.000000e+00> : vector<2x8xf32>
    %47 = vector.multi_reduction <add>, %46, %cst_44 [2] : vector<2x8x8xf32> to vector<2x8xf32>
    %48 = vector.shape_cast %47 : vector<2x8xf32> to vector<2x8x1xf32>
    %49 = tpu.reciprocal %48 {approx = true} : vector<2x8x1xf32> -> vector<2x8x1xf32>
    %50 = vector.broadcast %49 : vector<2x8x1xf32> to vector<2x8x8xf32>
    %51 = arith.mulf %46, %50 : vector<2x8x8xf32>
    "tpu.trace_start"() <{level = 10 : i32, message = "bqk,bkd->bqd"}> : () -> ()
    %cst_45 = arith.constant dense<0.000000e+00> : vector<2x8x8xf32>
    %52 = tpu.matmul %51, %37, %cst_45 {dimension_numbers = #tpu.dot_dimension_numbers<[2], [1], [1], [2], [0, 0, 0, 1, 1, 2], [0], [0]>} : vector<2x8x8xf32>, vector<2x8x8xf32>, vector<2x8x8xf32> -> vector<2x8x8xf32>
    "tpu.trace_stop"() : () -> ()
    %53 = vector.extract_strided_slice %34 {offsets = [0, 0, 8], sizes = [2, 8, 8], strides = [1, 1, 1]} : vector<2x8x96xf32> to vector<2x8x8xf32>
    %54 = vector.extract_strided_slice %34 {offsets = [0, 0, 40], sizes = [2, 8, 8], strides = [1, 1, 1]} : vector<2x8x96xf32> to vector<2x8x8xf32>
    %55 = vector.extract_strided_slice %34 {offsets = [0, 0, 72], sizes = [2, 8, 8], strides = [1, 1, 1]} : vector<2x8x96xf32> to vector<2x8x8xf32>
    "tpu.trace_start"() <{level = 10 : i32, message = "bqd,bkd->bqk"}> : () -> ()
    %cst_46 = arith.constant dense<0.000000e+00> : vector<2x8x8xf32>
    %56 = tpu.matmul %53, %54, %cst_46 {dimension_numbers = #tpu.dot_dimension_numbers<[2], [2], [1], [1], [0, 0, 0, 1, 1, 1], [0], [0]>} : vector<2x8x8xf32>, vector<2x8x8xf32>, vector<2x8x8xf32> -> vector<2x8x8xf32>
    "tpu.trace_stop"() : () -> ()
    %57 = vector.shape_cast %5 : vector<8x8xf32> to vector<1x8x8xf32>
    %58 = vector.broadcast %57 : vector<1x8x8xf32> to vector<2x8x8xf32>
    %59 = arith.addf %56, %58 : vector<2x8x8xf32>
    %cst_47 = arith.constant dense<0xFF800000> : vector<2x8xf32>
    %60 = vector.multi_reduction <maximumf>, %59, %cst_47 [2] : vector<2x8x8xf32> to vector<2x8xf32>
    %61 = vector.shape_cast %60 : vector<2x8xf32> to vector<2x8x1xf32>
    %62 = vector.broadcast %61 : vector<2x8x1xf32> to vector<2x8x8xf32>
    %63 = arith.subf %59, %62 : vector<2x8x8xf32>
    %64 = math.exp %63 : vector<2x8x8xf32>
    %cst_48 = arith.constant dense<0.000000e+00> : vector<2x8xf32>
    %65 = vector.multi_reduction <add>, %64, %cst_48 [2] : vector<2x8x8xf32> to vector<2x8xf32>
    %66 = vector.shape_cast %65 : vector<2x8xf32> to vector<2x8x1xf32>
    %67 = tpu.reciprocal %66 {approx = true} : vector<2x8x1xf32> -> vector<2x8x1xf32>
    %68 = vector.broadcast %67 : vector<2x8x1xf32> to vector<2x8x8xf32>
    %69 = arith.mulf %64, %68 : vector<2x8x8xf32>
    "tpu.trace_start"() <{level = 10 : i32, message = "bqk,bkd->bqd"}> : () -> ()
    %cst_49 = arith.constant dense<0.000000e+00> : vector<2x8x8xf32>
    %70 = tpu.matmul %69, %55, %cst_49 {dimension_numbers = #tpu.dot_dimension_numbers<[2], [1], [1], [2], [0, 0, 0, 1, 1, 2], [0], [0]>} : vector<2x8x8xf32>, vector<2x8x8xf32>, vector<2x8x8xf32> -> vector<2x8x8xf32>
    "tpu.trace_stop"() : () -> ()
    %71 = vector.extract_strided_slice %34 {offsets = [0, 0, 16], sizes = [2, 8, 8], strides = [1, 1, 1]} : vector<2x8x96xf32> to vector<2x8x8xf32>
    %72 = vector.extract_strided_slice %34 {offsets = [0, 0, 48], sizes = [2, 8, 8], strides = [1, 1, 1]} : vector<2x8x96xf32> to vector<2x8x8xf32>
    %73 = vector.extract_strided_slice %34 {offsets = [0, 0, 80], sizes = [2, 8, 8], strides = [1, 1, 1]} : vector<2x8x96xf32> to vector<2x8x8xf32>
    "tpu.trace_start"() <{level = 10 : i32, message = "bqd,bkd->bqk"}> : () -> ()
    %cst_50 = arith.constant dense<0.000000e+00> : vector<2x8x8xf32>
    %74 = tpu.matmul %71, %72, %cst_50 {dimension_numbers = #tpu.dot_dimension_numbers<[2], [2], [1], [1], [0, 0, 0, 1, 1, 1], [0], [0]>} : vector<2x8x8xf32>, vector<2x8x8xf32>, vector<2x8x8xf32> -> vector<2x8x8xf32>
    "tpu.trace_stop"() : () -> ()
    %75 = vector.shape_cast %5 : vector<8x8xf32> to vector<1x8x8xf32>
    %76 = vector.broadcast %75 : vector<1x8x8xf32> to vector<2x8x8xf32>
    %77 = arith.addf %74, %76 : vector<2x8x8xf32>
    %cst_51 = arith.constant dense<0xFF800000> : vector<2x8xf32>
    %78 = vector.multi_reduction <maximumf>, %77, %cst_51 [2] : vector<2x8x8xf32> to vector<2x8xf32>
    %79 = vector.shape_cast %78 : vector<2x8xf32> to vector<2x8x1xf32>
    %80 = vector.broadcast %79 : vector<2x8x1xf32> to vector<2x8x8xf32>
    %81 = arith.subf %77, %80 : vector<2x8x8xf32>
    %82 = math.exp %81 : vector<2x8x8xf32>
    %cst_52 = arith.constant dense<0.000000e+00> : vector<2x8xf32>
    %83 = vector.multi_reduction <add>, %82, %cst_52 [2] : vector<2x8x8xf32> to vector<2x8xf32>
    %84 = vector.shape_cast %83 : vector<2x8xf32> to vector<2x8x1xf32>
    %85 = tpu.reciprocal %84 {approx = true} : vector<2x8x1xf32> -> vector<2x8x1xf32>
    %86 = vector.broadcast %85 : vector<2x8x1xf32> to vector<2x8x8xf32>
    %87 = arith.mulf %82, %86 : vector<2x8x8xf32>
    "tpu.trace_start"() <{level = 10 : i32, message = "bqk,bkd->bqd"}> : () -> ()
    %cst_53 = arith.constant dense<0.000000e+00> : vector<2x8x8xf32>
    %88 = tpu.matmul %87, %73, %cst_53 {dimension_numbers = #tpu.dot_dimension_numbers<[2], [1], [1], [2], [0, 0, 0, 1, 1, 2], [0], [0]>} : vector<2x8x8xf32>, vector<2x8x8xf32>, vector<2x8x8xf32> -> vector<2x8x8xf32>
    "tpu.trace_stop"() : () -> ()
    %89 = vector.extract_strided_slice %34 {offsets = [0, 0, 24], sizes = [2, 8, 8], strides = [1, 1, 1]} : vector<2x8x96xf32> to vector<2x8x8xf32>
    %90 = vector.extract_strided_slice %34 {offsets = [0, 0, 56], sizes = [2, 8, 8], strides = [1, 1, 1]} : vector<2x8x96xf32> to vector<2x8x8xf32>
    %91 = vector.extract_strided_slice %34 {offsets = [0, 0, 88], sizes = [2, 8, 8], strides = [1, 1, 1]} : vector<2x8x96xf32> to vector<2x8x8xf32>
    "tpu.trace_start"() <{level = 10 : i32, message = "bqd,bkd->bqk"}> : () -> ()
    %cst_54 = arith.constant dense<0.000000e+00> : vector<2x8x8xf32>
    %92 = tpu.matmul %89, %90, %cst_54 {dimension_numbers = #tpu.dot_dimension_numbers<[2], [2], [1], [1], [0, 0, 0, 1, 1, 1], [0], [0]>} : vector<2x8x8xf32>, vector<2x8x8xf32>, vector<2x8x8xf32> -> vector<2x8x8xf32>
    "tpu.trace_stop"() : () -> ()
    %93 = vector.shape_cast %5 : vector<8x8xf32> to vector<1x8x8xf32>
    %94 = vector.broadcast %93 : vector<1x8x8xf32> to vector<2x8x8xf32>
    %95 = arith.addf %92, %94 : vector<2x8x8xf32>
    %cst_55 = arith.constant dense<0xFF800000> : vector<2x8xf32>
    %96 = vector.multi_reduction <maximumf>, %95, %cst_55 [2] : vector<2x8x8xf32> to vector<2x8xf32>
    %97 = vector.shape_cast %96 : vector<2x8xf32> to vector<2x8x1xf32>
    %98 = vector.broadcast %97 : vector<2x8x1xf32> to vector<2x8x8xf32>
    %99 = arith.subf %95, %98 : vector<2x8x8xf32>
    %100 = math.exp %99 : vector<2x8x8xf32>
    %cst_56 = arith.constant dense<0.000000e+00> : vector<2x8xf32>
    %101 = vector.multi_reduction <add>, %100, %cst_56 [2] : vector<2x8x8xf32> to vector<2x8xf32>
    %102 = vector.shape_cast %101 : vector<2x8xf32> to vector<2x8x1xf32>
    %103 = tpu.reciprocal %102 {approx = true} : vector<2x8x1xf32> -> vector<2x8x1xf32>
    %104 = vector.broadcast %103 : vector<2x8x1xf32> to vector<2x8x8xf32>
    %105 = arith.mulf %100, %104 : vector<2x8x8xf32>
    "tpu.trace_start"() <{level = 10 : i32, message = "bqk,bkd->bqd"}> : () -> ()
    %cst_57 = arith.constant dense<0.000000e+00> : vector<2x8x8xf32>
    %106 = tpu.matmul %105, %91, %cst_57 {dimension_numbers = #tpu.dot_dimension_numbers<[2], [1], [1], [2], [0, 0, 0, 1, 1, 2], [0], [0]>} : vector<2x8x8xf32>, vector<2x8x8xf32>, vector<2x8x8xf32> -> vector<2x8x8xf32>
    "tpu.trace_stop"() : () -> ()
    %107 = tpu.concatenate %52, %70, %88, %106 in 2 : vector<2x8x8xf32>, vector<2x8x8xf32>, vector<2x8x8xf32>, vector<2x8x8xf32> -> vector<2x8x32xf32>
    %108 = vector.shape_cast %107 : vector<2x8x32xf32> to vector<16x32xf32>
    %cst_58 = arith.constant dense<0.000000e+00> : vector<16x32xf32>
    %109 = tpu.matmul %108, %11, %cst_58 {dimension_numbers = #tpu.dot_dimension_numbers<[1], [0], [0], [1], [0, 0, 1, 1], [], []>} : vector<16x32xf32>, vector<32x32xf32>, vector<16x32xf32> -> vector<16x32xf32>
    %110 = vector.broadcast %13 : vector<1x32xf32> to vector<16x32xf32>
    %111 = arith.addf %109, %110 : vector<16x32xf32>
    %112 = arith.addf %30, %111 : vector<16x32xf32>
    %cst_59 = arith.constant dense<0.000000e+00> : vector<16xf32>
    %113 = vector.multi_reduction <add>, %112, %cst_59 [1] : vector<16x32xf32> to vector<16xf32>
    %114 = vector.shape_cast %113 : vector<16xf32> to vector<16x1xf32>
    %cst_60 = arith.constant 3.200000e+01 : f32
    %115 = vector.broadcast %cst_60 : f32 to vector<16x1xf32>
    %116 = arith.divf %114, %115 : vector<16x1xf32>
    %117 = vector.broadcast %116 : vector<16x1xf32> to vector<16x32xf32>
    %118 = arith.subf %112, %117 : vector<16x32xf32>
    %119 = arith.mulf %118, %118 : vector<16x32xf32>
    %cst_61 = arith.constant dense<0.000000e+00> : vector<16xf32>
    %120 = vector.multi_reduction <add>, %119, %cst_61 [1] : vector<16x32xf32> to vector<16xf32>
    %121 = vector.shape_cast %120 : vector<16xf32> to vector<16x1xf32>
    %cst_62 = arith.constant 3.200000e+01 : f32
    %122 = vector.broadcast %cst_62 : f32 to vector<16x1xf32>
    %123 = arith.divf %121, %122 : vector<16x1xf32>
    %124 = vector.broadcast %116 : vector<16x1xf32> to vector<16x32xf32>
    %125 = arith.subf %112, %124 : vector<16x32xf32>
    %cst_63 = arith.constant 9.99999974E-6 : f32
    %126 = vector.broadcast %cst_63 : f32 to vector<16x1xf32>
    %127 = arith.addf %123, %126 : vector<16x1xf32>
    %128 = math.rsqrt %127 : vector<16x1xf32>
    %129 = vector.broadcast %128 : vector<16x1xf32> to vector<16x32xf32>
    %130 = arith.mulf %125, %129 : vector<16x32xf32>
    %131 = vector.broadcast %15 : vector<1x32xf32> to vector<16x32xf32>
    %132 = arith.mulf %130, %131 : vector<16x32xf32>
    %133 = vector.broadcast %17 : vector<1x32xf32> to vector<16x32xf32>
    %134 = arith.addf %132, %133 : vector<16x32xf32>
    %cst_64 = arith.constant dense<0.000000e+00> : vector<16x64xf32>
    %135 = tpu.matmul %134, %19, %cst_64 {dimension_numbers = #tpu.dot_dimension_numbers<[1], [0], [0], [1], [0, 0, 1, 1], [], []>} : vector<16x32xf32>, vector<32x64xf32>, vector<16x64xf32> -> vector<16x64xf32>
    %136 = vector.broadcast %21 : vector<1x64xf32> to vector<16x64xf32>
    %137 = arith.addf %135, %136 : vector<16x64xf32>
    %cst_65 = arith.constant 0.000000e+00 : f32
    %138 = vector.broadcast %cst_65 : f32 to vector<16x64xf32>
    %139 = arith.maximumf %137, %138 : vector<16x64xf32>
    %cst_66 = arith.constant dense<0.000000e+00> : vector<16x32xf32>
    %140 = tpu.matmul %139, %23, %cst_66 {dimension_numbers = #tpu.dot_dimension_numbers<[1], [0], [0], [1], [0, 0, 1, 1], [], []>} : vector<16x64xf32>, vector<64x32xf32>, vector<16x32xf32> -> vector<16x32xf32>
    %141 = vector.broadcast %25 : vector<1x32xf32> to vector<16x32xf32>
    %142 = arith.addf %140, %141 : vector<16x32xf32>
    %143 = arith.addf %134, %142 : vector<16x32xf32>
    %cst_67 = arith.constant dense<0.000000e+00> : vector<16xf32>
    %144 = vector.multi_reduction <add>, %143, %cst_67 [1] : vector<16x32xf32> to vector<16xf32>
    %145 = vector.shape_cast %144 : vector<16xf32> to vector<16x1xf32>
    %cst_68 = arith.constant 3.200000e+01 : f32
    %146 = vector.broadcast %cst_68 : f32 to vector<16x1xf32>
    %147 = arith.divf %145, %146 : vector<16x1xf32>
    %148 = vector.broadcast %147 : vector<16x1xf32> to vector<16x32xf32>
    %149 = arith.subf %143, %148 : vector<16x32xf32>
    %150 = arith.mulf %149, %149 : vector<16x32xf32>
    %cst_69 = arith.constant dense<0.000000e+00> : vector<16xf32>
    %151 = vector.multi_reduction <add>, %150, %cst_69 [1] : vector<16x32xf32> to vector<16xf32>
    %152 = vector.shape_cast %151 : vector<16xf32> to vector<16x1xf32>
    %cst_70 = arith.constant 3.200000e+01 : f32
    %153 = vector.broadcast %cst_70 : f32 to vector<16x1xf32>
    %154 = arith.divf %152, %153 : vector<16x1xf32>
    %155 = vector.broadcast %147 : vector<16x1xf32> to vector<16x32xf32>
    %156 = arith.subf %143, %155 : vector<16x32xf32>
    %cst_71 = arith.constant 9.99999974E-6 : f32
    %157 = vector.broadcast %cst_71 : f32 to vector<16x1xf32>
    %158 = arith.addf %154, %157 : vector<16x1xf32>
    %159 = math.rsqrt %158 : vector<16x1xf32>
    %160 = vector.broadcast %159 : vector<16x1xf32> to vector<16x32xf32>
    %161 = arith.mulf %156, %160 : vector<16x32xf32>
    %162 = vector.broadcast %27 : vector<1x32xf32> to vector<16x32xf32>
    %163 = arith.mulf %161, %162 : vector<16x32xf32>
    %164 = vector.broadcast %29 : vector<1x32xf32> to vector<16x32xf32>
    %165 = arith.addf %163, %164 : vector<16x32xf32>
    %166 = vector.shape_cast %165 : vector<16x32xf32> to vector<2x8x32xf32>
    %c1 = arith.constant 1 : index
    %c0_72 = arith.constant 0 : index
    %c0_73 = arith.constant 0 : index
    %167 = vector.load %arg3[%c1, %c0_72, %c0_73] : memref<2x32x96xf32, #tpu.memory_space<vmem>>, vector<1x32x96xf32>
    %168 = vector.shape_cast %167 : vector<1x32x96xf32> to vector<32x96xf32>
    %c1_74 = arith.constant 1 : index
    %c0_75 = arith.constant 0 : index
    %c0_76 = arith.constant 0 : index
    %169 = vector.load %arg4[%c1_74, %c0_75, %c0_76] : memref<2x1x96xf32, #tpu.memory_space<vmem>>, vector<1x1x96xf32>
    %170 = vector.shape_cast %169 : vector<1x1x96xf32> to vector<1x96xf32>
    %c1_77 = arith.constant 1 : index
    %c0_78 = arith.constant 0 : index
    %c0_79 = arith.constant 0 : index
    %171 = vector.load %arg5[%c1_77, %c0_78, %c0_79] : memref<2x32x32xf32, #tpu.memory_space<vmem>>, vector<1x32x32xf32>
    %172 = vector.shape_cast %171 : vector<1x32x32xf32> to vector<32x32xf32>
    %c1_80 = arith.constant 1 : index
    %c0_81 = arith.constant 0 : index
    %c0_82 = arith.constant 0 : index
    %173 = vector.load %arg6[%c1_80, %c0_81, %c0_82] : memref<2x1x32xf32, #tpu.memory_space<vmem>>, vector<1x1x32xf32>
    %174 = vector.shape_cast %173 : vector<1x1x32xf32> to vector<1x32xf32>
    %c1_83 = arith.constant 1 : index
    %c0_84 = arith.constant 0 : index
    %c0_85 = arith.constant 0 : index
    %175 = vector.load %arg7[%c1_83, %c0_84, %c0_85] : memref<2x1x32xf32, #tpu.memory_space<vmem>>, vector<1x1x32xf32>
    %176 = vector.shape_cast %175 : vector<1x1x32xf32> to vector<1x32xf32>
    %c1_86 = arith.constant 1 : index
    %c0_87 = arith.constant 0 : index
    %c0_88 = arith.constant 0 : index
    %177 = vector.load %arg8[%c1_86, %c0_87, %c0_88] : memref<2x1x32xf32, #tpu.memory_space<vmem>>, vector<1x1x32xf32>
    %178 = vector.shape_cast %177 : vector<1x1x32xf32> to vector<1x32xf32>
    %c1_89 = arith.constant 1 : index
    %c0_90 = arith.constant 0 : index
    %c0_91 = arith.constant 0 : index
    %179 = vector.load %arg9[%c1_89, %c0_90, %c0_91] : memref<2x32x64xf32, #tpu.memory_space<vmem>>, vector<1x32x64xf32>
    %180 = vector.shape_cast %179 : vector<1x32x64xf32> to vector<32x64xf32>
    %c1_92 = arith.constant 1 : index
    %c0_93 = arith.constant 0 : index
    %c0_94 = arith.constant 0 : index
    %181 = vector.load %arg10[%c1_92, %c0_93, %c0_94] : memref<2x1x64xf32, #tpu.memory_space<vmem>>, vector<1x1x64xf32>
    %182 = vector.shape_cast %181 : vector<1x1x64xf32> to vector<1x64xf32>
    %c1_95 = arith.constant 1 : index
    %c0_96 = arith.constant 0 : index
    %c0_97 = arith.constant 0 : index
    %183 = vector.load %arg11[%c1_95, %c0_96, %c0_97] : memref<2x64x32xf32, #tpu.memory_space<vmem>>, vector<1x64x32xf32>
    %184 = vector.shape_cast %183 : vector<1x64x32xf32> to vector<64x32xf32>
    %c1_98 = arith.constant 1 : index
    %c0_99 = arith.constant 0 : index
    %c0_100 = arith.constant 0 : index
    %185 = vector.load %arg12[%c1_98, %c0_99, %c0_100] : memref<2x1x32xf32, #tpu.memory_space<vmem>>, vector<1x1x32xf32>
    %186 = vector.shape_cast %185 : vector<1x1x32xf32> to vector<1x32xf32>
    %c1_101 = arith.constant 1 : index
    %c0_102 = arith.constant 0 : index
    %c0_103 = arith.constant 0 : index
    %187 = vector.load %arg13[%c1_101, %c0_102, %c0_103] : memref<2x1x32xf32, #tpu.memory_space<vmem>>, vector<1x1x32xf32>
    %188 = vector.shape_cast %187 : vector<1x1x32xf32> to vector<1x32xf32>
    %c1_104 = arith.constant 1 : index
    %c0_105 = arith.constant 0 : index
    %c0_106 = arith.constant 0 : index
    %189 = vector.load %arg14[%c1_104, %c0_105, %c0_106] : memref<2x1x32xf32, #tpu.memory_space<vmem>>, vector<1x1x32xf32>
    %190 = vector.shape_cast %189 : vector<1x1x32xf32> to vector<1x32xf32>
    %191 = vector.shape_cast %166 : vector<2x8x32xf32> to vector<16x32xf32>
    %cst_107 = arith.constant dense<0.000000e+00> : vector<16x96xf32>
    %192 = tpu.matmul %191, %168, %cst_107 {dimension_numbers = #tpu.dot_dimension_numbers<[1], [0], [0], [1], [0, 0, 1, 1], [], []>} : vector<16x32xf32>, vector<32x96xf32>, vector<16x96xf32> -> vector<16x96xf32>
    %193 = vector.broadcast %170 : vector<1x96xf32> to vector<16x96xf32>
    %194 = arith.addf %192, %193 : vector<16x96xf32>
    %195 = vector.shape_cast %194 : vector<16x96xf32> to vector<2x8x96xf32>
    %196 = vector.extract_strided_slice %195 {offsets = [0, 7, 0], sizes = [2, 1, 8], strides = [1, 1, 1]} : vector<2x8x96xf32> to vector<2x1x8xf32>
    %197 = vector.extract_strided_slice %195 {offsets = [0, 0, 32], sizes = [2, 8, 8], strides = [1, 1, 1]} : vector<2x8x96xf32> to vector<2x8x8xf32>
    %198 = vector.extract_strided_slice %195 {offsets = [0, 0, 64], sizes = [2, 8, 8], strides = [1, 1, 1]} : vector<2x8x96xf32> to vector<2x8x8xf32>
    "tpu.trace_start"() <{level = 10 : i32, message = "bqd,bkd->bqk"}> : () -> ()
    %cst_108 = arith.constant dense<0.000000e+00> : vector<2x1x8xf32>
    %199 = tpu.matmul %196, %197, %cst_108 {dimension_numbers = #tpu.dot_dimension_numbers<[2], [2], [1], [1], [0, 0, 0, 1, 1, 1], [0], [0]>} : vector<2x1x8xf32>, vector<2x8x8xf32>, vector<2x1x8xf32> -> vector<2x1x8xf32>
    "tpu.trace_stop"() : () -> ()
    %cst_109 = arith.constant dense<0xFF800000> : vector<2x1xf32>
    %200 = vector.multi_reduction <maximumf>, %199, %cst_109 [2] : vector<2x1x8xf32> to vector<2x1xf32>
    %201 = vector.shape_cast %200 : vector<2x1xf32> to vector<2x1x1xf32>
    %202 = vector.broadcast %201 : vector<2x1x1xf32> to vector<2x1x8xf32>
    %203 = arith.subf %199, %202 : vector<2x1x8xf32>
    %204 = math.exp %203 : vector<2x1x8xf32>
    %cst_110 = arith.constant dense<0.000000e+00> : vector<2x1xf32>
    %205 = vector.multi_reduction <add>, %204, %cst_110 [2] : vector<2x1x8xf32> to vector<2x1xf32>
    %206 = vector.shape_cast %205 : vector<2x1xf32> to vector<2x1x1xf32>
    %207 = tpu.reciprocal %206 {approx = true} : vector<2x1x1xf32> -> vector<2x1x1xf32>
    %208 = vector.broadcast %207 : vector<2x1x1xf32> to vector<2x1x8xf32>
    %209 = arith.mulf %204, %208 : vector<2x1x8xf32>
    "tpu.trace_start"() <{level = 10 : i32, message = "bqk,bkd->bqd"}> : () -> ()
    %cst_111 = arith.constant dense<0.000000e+00> : vector<2x1x8xf32>
    %210 = tpu.matmul %209, %198, %cst_111 {dimension_numbers = #tpu.dot_dimension_numbers<[2], [1], [1], [2], [0, 0, 0, 1, 1, 2], [0], [0]>} : vector<2x1x8xf32>, vector<2x8x8xf32>, vector<2x1x8xf32> -> vector<2x1x8xf32>
    "tpu.trace_stop"() : () -> ()
    %211 = vector.extract_strided_slice %195 {offsets = [0, 7, 8], sizes = [2, 1, 8], strides = [1, 1, 1]} : vector<2x8x96xf32> to vector<2x1x8xf32>
    %212 = vector.extract_strided_slice %195 {offsets = [0, 0, 40], sizes = [2, 8, 8], strides = [1, 1, 1]} : vector<2x8x96xf32> to vector<2x8x8xf32>
    %213 = vector.extract_strided_slice %195 {offsets = [0, 0, 72], sizes = [2, 8, 8], strides = [1, 1, 1]} : vector<2x8x96xf32> to vector<2x8x8xf32>
    "tpu.trace_start"() <{level = 10 : i32, message = "bqd,bkd->bqk"}> : () -> ()
    %cst_112 = arith.constant dense<0.000000e+00> : vector<2x1x8xf32>
    %214 = tpu.matmul %211, %212, %cst_112 {dimension_numbers = #tpu.dot_dimension_numbers<[2], [2], [1], [1], [0, 0, 0, 1, 1, 1], [0], [0]>} : vector<2x1x8xf32>, vector<2x8x8xf32>, vector<2x1x8xf32> -> vector<2x1x8xf32>
    "tpu.trace_stop"() : () -> ()
    %cst_113 = arith.constant dense<0xFF800000> : vector<2x1xf32>
    %215 = vector.multi_reduction <maximumf>, %214, %cst_113 [2] : vector<2x1x8xf32> to vector<2x1xf32>
    %216 = vector.shape_cast %215 : vector<2x1xf32> to vector<2x1x1xf32>
    %217 = vector.broadcast %216 : vector<2x1x1xf32> to vector<2x1x8xf32>
    %218 = arith.subf %214, %217 : vector<2x1x8xf32>
    %219 = math.exp %218 : vector<2x1x8xf32>
    %cst_114 = arith.constant dense<0.000000e+00> : vector<2x1xf32>
    %220 = vector.multi_reduction <add>, %219, %cst_114 [2] : vector<2x1x8xf32> to vector<2x1xf32>
    %221 = vector.shape_cast %220 : vector<2x1xf32> to vector<2x1x1xf32>
    %222 = tpu.reciprocal %221 {approx = true} : vector<2x1x1xf32> -> vector<2x1x1xf32>
    %223 = vector.broadcast %222 : vector<2x1x1xf32> to vector<2x1x8xf32>
    %224 = arith.mulf %219, %223 : vector<2x1x8xf32>
    "tpu.trace_start"() <{level = 10 : i32, message = "bqk,bkd->bqd"}> : () -> ()
    %cst_115 = arith.constant dense<0.000000e+00> : vector<2x1x8xf32>
    %225 = tpu.matmul %224, %213, %cst_115 {dimension_numbers = #tpu.dot_dimension_numbers<[2], [1], [1], [2], [0, 0, 0, 1, 1, 2], [0], [0]>} : vector<2x1x8xf32>, vector<2x8x8xf32>, vector<2x1x8xf32> -> vector<2x1x8xf32>
    "tpu.trace_stop"() : () -> ()
    %226 = vector.extract_strided_slice %195 {offsets = [0, 7, 16], sizes = [2, 1, 8], strides = [1, 1, 1]} : vector<2x8x96xf32> to vector<2x1x8xf32>
    %227 = vector.extract_strided_slice %195 {offsets = [0, 0, 48], sizes = [2, 8, 8], strides = [1, 1, 1]} : vector<2x8x96xf32> to vector<2x8x8xf32>
    %228 = vector.extract_strided_slice %195 {offsets = [0, 0, 80], sizes = [2, 8, 8], strides = [1, 1, 1]} : vector<2x8x96xf32> to vector<2x8x8xf32>
    "tpu.trace_start"() <{level = 10 : i32, message = "bqd,bkd->bqk"}> : () -> ()
    %cst_116 = arith.constant dense<0.000000e+00> : vector<2x1x8xf32>
    %229 = tpu.matmul %226, %227, %cst_116 {dimension_numbers = #tpu.dot_dimension_numbers<[2], [2], [1], [1], [0, 0, 0, 1, 1, 1], [0], [0]>} : vector<2x1x8xf32>, vector<2x8x8xf32>, vector<2x1x8xf32> -> vector<2x1x8xf32>
    "tpu.trace_stop"() : () -> ()
    %cst_117 = arith.constant dense<0xFF800000> : vector<2x1xf32>
    %230 = vector.multi_reduction <maximumf>, %229, %cst_117 [2] : vector<2x1x8xf32> to vector<2x1xf32>
    %231 = vector.shape_cast %230 : vector<2x1xf32> to vector<2x1x1xf32>
    %232 = vector.broadcast %231 : vector<2x1x1xf32> to vector<2x1x8xf32>
    %233 = arith.subf %229, %232 : vector<2x1x8xf32>
    %234 = math.exp %233 : vector<2x1x8xf32>
    %cst_118 = arith.constant dense<0.000000e+00> : vector<2x1xf32>
    %235 = vector.multi_reduction <add>, %234, %cst_118 [2] : vector<2x1x8xf32> to vector<2x1xf32>
    %236 = vector.shape_cast %235 : vector<2x1xf32> to vector<2x1x1xf32>
    %237 = tpu.reciprocal %236 {approx = true} : vector<2x1x1xf32> -> vector<2x1x1xf32>
    %238 = vector.broadcast %237 : vector<2x1x1xf32> to vector<2x1x8xf32>
    %239 = arith.mulf %234, %238 : vector<2x1x8xf32>
    "tpu.trace_start"() <{level = 10 : i32, message = "bqk,bkd->bqd"}> : () -> ()
    %cst_119 = arith.constant dense<0.000000e+00> : vector<2x1x8xf32>
    %240 = tpu.matmul %239, %228, %cst_119 {dimension_numbers = #tpu.dot_dimension_numbers<[2], [1], [1], [2], [0, 0, 0, 1, 1, 2], [0], [0]>} : vector<2x1x8xf32>, vector<2x8x8xf32>, vector<2x1x8xf32> -> vector<2x1x8xf32>
    "tpu.trace_stop"() : () -> ()
    %241 = vector.extract_strided_slice %195 {offsets = [0, 7, 24], sizes = [2, 1, 8], strides = [1, 1, 1]} : vector<2x8x96xf32> to vector<2x1x8xf32>
    %242 = vector.extract_strided_slice %195 {offsets = [0, 0, 56], sizes = [2, 8, 8], strides = [1, 1, 1]} : vector<2x8x96xf32> to vector<2x8x8xf32>
    %243 = vector.extract_strided_slice %195 {offsets = [0, 0, 88], sizes = [2, 8, 8], strides = [1, 1, 1]} : vector<2x8x96xf32> to vector<2x8x8xf32>
    "tpu.trace_start"() <{level = 10 : i32, message = "bqd,bkd->bqk"}> : () -> ()
    %cst_120 = arith.constant dense<0.000000e+00> : vector<2x1x8xf32>
    %244 = tpu.matmul %241, %242, %cst_120 {dimension_numbers = #tpu.dot_dimension_numbers<[2], [2], [1], [1], [0, 0, 0, 1, 1, 1], [0], [0]>} : vector<2x1x8xf32>, vector<2x8x8xf32>, vector<2x1x8xf32> -> vector<2x1x8xf32>
    "tpu.trace_stop"() : () -> ()
    %cst_121 = arith.constant dense<0xFF800000> : vector<2x1xf32>
    %245 = vector.multi_reduction <maximumf>, %244, %cst_121 [2] : vector<2x1x8xf32> to vector<2x1xf32>
    %246 = vector.shape_cast %245 : vector<2x1xf32> to vector<2x1x1xf32>
    %247 = vector.broadcast %246 : vector<2x1x1xf32> to vector<2x1x8xf32>
    %248 = arith.subf %244, %247 : vector<2x1x8xf32>
    %249 = math.exp %248 : vector<2x1x8xf32>
    %cst_122 = arith.constant dense<0.000000e+00> : vector<2x1xf32>
    %250 = vector.multi_reduction <add>, %249, %cst_122 [2] : vector<2x1x8xf32> to vector<2x1xf32>
    %251 = vector.shape_cast %250 : vector<2x1xf32> to vector<2x1x1xf32>
    %252 = tpu.reciprocal %251 {approx = true} : vector<2x1x1xf32> -> vector<2x1x1xf32>
    %253 = vector.broadcast %252 : vector<2x1x1xf32> to vector<2x1x8xf32>
    %254 = arith.mulf %249, %253 : vector<2x1x8xf32>
    "tpu.trace_start"() <{level = 10 : i32, message = "bqk,bkd->bqd"}> : () -> ()
    %cst_123 = arith.constant dense<0.000000e+00> : vector<2x1x8xf32>
    %255 = tpu.matmul %254, %243, %cst_123 {dimension_numbers = #tpu.dot_dimension_numbers<[2], [1], [1], [2], [0, 0, 0, 1, 1, 2], [0], [0]>} : vector<2x1x8xf32>, vector<2x8x8xf32>, vector<2x1x8xf32> -> vector<2x1x8xf32>
    "tpu.trace_stop"() : () -> ()
    %256 = tpu.concatenate %210, %225, %240, %255 in 2 : vector<2x1x8xf32>, vector<2x1x8xf32>, vector<2x1x8xf32>, vector<2x1x8xf32> -> vector<2x1x32xf32>
    %257 = vector.shape_cast %256 : vector<2x1x32xf32> to vector<2x32xf32>
    %cst_124 = arith.constant dense<0.000000e+00> : vector<2x32xf32>
    %258 = tpu.matmul %257, %172, %cst_124 {dimension_numbers = #tpu.dot_dimension_numbers<[1], [0], [0], [1], [0, 0, 1, 1], [], []>} : vector<2x32xf32>, vector<32x32xf32>, vector<2x32xf32> -> vector<2x32xf32>
    %259 = vector.broadcast %174 : vector<1x32xf32> to vector<2x32xf32>
    %260 = arith.addf %258, %259 : vector<2x32xf32>
    %261 = vector.extract_strided_slice %166 {offsets = [0, 7, 0], sizes = [2, 1, 32], strides = [1, 1, 1]} : vector<2x8x32xf32> to vector<2x1x32xf32>
    %262 = vector.shape_cast %261 : vector<2x1x32xf32> to vector<2x32xf32>
    %263 = arith.addf %262, %260 : vector<2x32xf32>
    %cst_125 = arith.constant dense<0.000000e+00> : vector<2xf32>
    %264 = vector.multi_reduction <add>, %263, %cst_125 [1] : vector<2x32xf32> to vector<2xf32>
    %265 = vector.shape_cast %264 : vector<2xf32> to vector<2x1xf32>
    %cst_126 = arith.constant 3.200000e+01 : f32
    %266 = vector.broadcast %cst_126 : f32 to vector<2x1xf32>
    %267 = arith.divf %265, %266 : vector<2x1xf32>
    %268 = vector.broadcast %267 : vector<2x1xf32> to vector<2x32xf32>
    %269 = arith.subf %263, %268 : vector<2x32xf32>
    %270 = arith.mulf %269, %269 : vector<2x32xf32>
    %cst_127 = arith.constant dense<0.000000e+00> : vector<2xf32>
    %271 = vector.multi_reduction <add>, %270, %cst_127 [1] : vector<2x32xf32> to vector<2xf32>
    %272 = vector.shape_cast %271 : vector<2xf32> to vector<2x1xf32>
    %cst_128 = arith.constant 3.200000e+01 : f32
    %273 = vector.broadcast %cst_128 : f32 to vector<2x1xf32>
    %274 = arith.divf %272, %273 : vector<2x1xf32>
    %275 = vector.broadcast %267 : vector<2x1xf32> to vector<2x32xf32>
    %276 = arith.subf %263, %275 : vector<2x32xf32>
    %cst_129 = arith.constant 9.99999974E-6 : f32
    %277 = vector.broadcast %cst_129 : f32 to vector<2x1xf32>
    %278 = arith.addf %274, %277 : vector<2x1xf32>
    %279 = math.rsqrt %278 : vector<2x1xf32>
    %280 = vector.broadcast %279 : vector<2x1xf32> to vector<2x32xf32>
    %281 = arith.mulf %276, %280 : vector<2x32xf32>
    %282 = vector.broadcast %176 : vector<1x32xf32> to vector<2x32xf32>
    %283 = arith.mulf %281, %282 : vector<2x32xf32>
    %284 = vector.broadcast %178 : vector<1x32xf32> to vector<2x32xf32>
    %285 = arith.addf %283, %284 : vector<2x32xf32>
    %cst_130 = arith.constant dense<0.000000e+00> : vector<2x64xf32>
    %286 = tpu.matmul %285, %180, %cst_130 {dimension_numbers = #tpu.dot_dimension_numbers<[1], [0], [0], [1], [0, 0, 1, 1], [], []>} : vector<2x32xf32>, vector<32x64xf32>, vector<2x64xf32> -> vector<2x64xf32>
    %287 = vector.broadcast %182 : vector<1x64xf32> to vector<2x64xf32>
    %288 = arith.addf %286, %287 : vector<2x64xf32>
    %cst_131 = arith.constant 0.000000e+00 : f32
    %289 = vector.broadcast %cst_131 : f32 to vector<2x64xf32>
    %290 = arith.maximumf %288, %289 : vector<2x64xf32>
    %cst_132 = arith.constant dense<0.000000e+00> : vector<2x32xf32>
    %291 = tpu.matmul %290, %184, %cst_132 {dimension_numbers = #tpu.dot_dimension_numbers<[1], [0], [0], [1], [0, 0, 1, 1], [], []>} : vector<2x64xf32>, vector<64x32xf32>, vector<2x32xf32> -> vector<2x32xf32>
    %292 = vector.broadcast %186 : vector<1x32xf32> to vector<2x32xf32>
    %293 = arith.addf %291, %292 : vector<2x32xf32>
    %294 = arith.addf %285, %293 : vector<2x32xf32>
    %cst_133 = arith.constant dense<0.000000e+00> : vector<2xf32>
    %295 = vector.multi_reduction <add>, %294, %cst_133 [1] : vector<2x32xf32> to vector<2xf32>
    %296 = vector.shape_cast %295 : vector<2xf32> to vector<2x1xf32>
    %cst_134 = arith.constant 3.200000e+01 : f32
    %297 = vector.broadcast %cst_134 : f32 to vector<2x1xf32>
    %298 = arith.divf %296, %297 : vector<2x1xf32>
    %299 = vector.broadcast %298 : vector<2x1xf32> to vector<2x32xf32>
    %300 = arith.subf %294, %299 : vector<2x32xf32>
    %301 = arith.mulf %300, %300 : vector<2x32xf32>
    %cst_135 = arith.constant dense<0.000000e+00> : vector<2xf32>
    %302 = vector.multi_reduction <add>, %301, %cst_135 [1] : vector<2x32xf32> to vector<2xf32>
    %303 = vector.shape_cast %302 : vector<2xf32> to vector<2x1xf32>
    %cst_136 = arith.constant 3.200000e+01 : f32
    %304 = vector.broadcast %cst_136 : f32 to vector<2x1xf32>
    %305 = arith.divf %303, %304 : vector<2x1xf32>
    %306 = vector.broadcast %298 : vector<2x1xf32> to vector<2x32xf32>
    %307 = arith.subf %294, %306 : vector<2x32xf32>
    %cst_137 = arith.constant 9.99999974E-6 : f32
    %308 = vector.broadcast %cst_137 : f32 to vector<2x1xf32>
    %309 = arith.addf %305, %308 : vector<2x1xf32>
    %310 = math.rsqrt %309 : vector<2x1xf32>
    %311 = vector.broadcast %310 : vector<2x1xf32> to vector<2x32xf32>
    %312 = arith.mulf %307, %311 : vector<2x32xf32>
    %313 = vector.broadcast %188 : vector<1x32xf32> to vector<2x32xf32>
    %314 = arith.mulf %312, %313 : vector<2x32xf32>
    %315 = vector.broadcast %190 : vector<1x32xf32> to vector<2x32xf32>
    %316 = arith.addf %314, %315 : vector<2x32xf32>
    %c0_138 = arith.constant 0 : index
    %c0_139 = arith.constant 0 : index
    %317 = vector.load %arg15[%c0_138, %c0_139] : memref<32x1xf32, #tpu.memory_space<vmem>>, vector<32x1xf32>
    %cst_140 = arith.constant dense<0.000000e+00> : vector<2x1xf32>
    %318 = tpu.matmul %316, %317, %cst_140 {dimension_numbers = #tpu.dot_dimension_numbers<[1], [0], [0], [1], [0, 0, 1, 1], [], []>} : vector<2x32xf32>, vector<32x1xf32>, vector<2x1xf32> -> vector<2x1xf32>
    %c0_141 = arith.constant 0 : index
    %c0_142 = arith.constant 0 : index
    %319 = vector.load %arg16[%c0_141, %c0_142] : memref<1x1xf32, #tpu.memory_space<vmem>>, vector<1x1xf32>
    %320 = vector.broadcast %319 : vector<1x1xf32> to vector<2x1xf32>
    %321 = arith.addf %318, %320 : vector<2x1xf32>
    %322 = vector.shape_cast %321 : vector<2x1xf32> to vector<2x1xf32>
    %323 = vector.broadcast %322 : vector<2x1xf32> to vector<2x128xf32>
    %c0_143 = arith.constant 0 : index
    %c0_144 = arith.constant 0 : index
    %324 = vector.load %arg17[%c0_143, %c0_144] : memref<2x128xf32, #tpu.memory_space<vmem>>, vector<2x128xf32>
    tpu.vector_store %arg17[%c0_143, %c0_144], %323 {strides = array<i32>} : memref<2x128xf32, #tpu.memory_space<vmem>>, vector<2x128xf32>,
    return
  }
}

</mosaic_0001>

<bundles_post_ra>
// kernel: forward.1
= control target key start
LH: loop header
LB: loop body
LE: loop exit
PB: predicated region body
PF: predicated region fallthrough
CT: control target
= control target key end

     0   :  { %vm98_vm0 = vcmask 261120   ;;  %v4528_v11 = vmov 0.0   ;;  %vm4529_vm1 = vmmov 0   ;;  %s4530_s27 = smov 96   ;;  %vm183_vm2 = vcmask 64512   ;;  %s4533_s30 = smov 120   ;;  %s5241_s3 = inlined_call_operand.vmem [shape: f32[2,32,96], index: 3, kind: input, shape index: {}]   ;;  %s5242_s0 = inlined_call_operand.vmem [shape: f32[2,8,32], index: 0, kind: input, shape index: {}]   ;;  %s5243_s1 = inlined_call_operand.vmem [shape: f32[8,32], index: 1, kind: input, shape index: {}]   ;;  %s5244_s4 = inlined_call_operand.vmem [shape: f32[2,1,96], index: 4, kind: input, shape index: {}]   ;;  %s5245_s2 = inlined_call_operand.vmem [shape: f32[8,8], index: 2, kind: input, shape index: {}]   ;;  %s5246_s5 = inlined_call_operand.vmem [shape: f32[2,32,32], index: 5, kind: input, shape index: {}]   ;;  %s5247_s6 = inlined_call_operand.vmem [shape: f32[2,1,32], index: 6, kind: input, shape index: {}]   ;;  %s5248_s9 = inlined_call_operand.vmem [shape: f32[2,32,64], index: 9, kind: input, shape index: {}]   ;;  %s5249_s11 = inlined_call_operand.vmem [shape: f32[2,64,32], index: 11, kind: input, shape index: {}]   ;;  %s5250_s7 = inlined_call_operand.vmem [shape: f32[2,1,32], index: 7, kind: input, shape index: {}]   ;;  %s5251_s8 = inlined_call_operand.vmem [shape: f32[2,1,32], index: 8, kind: input, shape index: {}]   ;;  %s5252_s10 = inlined_call_operand.vmem [shape: f32[2,1,64], index: 10, kind: input, shape index: {}]   ;;  %s5253_s12 = inlined_call_operand.vmem [shape: f32[2,1,32], index: 12, kind: input, shape index: {}]   ;;  %s5254_s13 = inlined_call_operand.vmem [shape: f32[2,1,32], index: 13, kind: input, shape index: {}]   ;;  %s5255_s14 = inlined_call_operand.vmem [shape: f32[2,1,32], index: 14, kind: input, shape index: {}]   ;;  %s5256_s15 = inlined_call_operand.vmem [shape: f32[32,1], index: 15, kind: input, shape index: {}]   ;;  %s5257_s16 = inlined_call_operand.<no memory space> [shape: f32[1,1], index: 16, kind: input, shape index: {}]   ;;  %s5258_s17 = inlined_call_operand.vmem [shape: f32[2,128], index: 17, kind: output, shape index: {}]  }
   0x1   :  { %5277 = sst [smem:[#allocation3_spill]] %s5241_s3  ;;  %v60_v7 = vld [vmem:[%s5243_s1] sm:$0xff]  ;;  %4086 = vmatprep.subr.mxu1 %v4528_v11  ;;  %4088 = vmatprep.mubr.msk.f32.mxu1 %vm4529_vm1, %v4528_v11  ;;  %s4531_s3 = smov 64   ;;  %vm1528_vm3 = vcmask 195584   ;;  %vm1525_vm4 = vcmask 130048   ;;  %vm1758_vm5 = vcmask 523264  }
   0x2   :  { %5278 = sst [smem:[#allocation4_spill]] %s5242_s0  ;;  %s5279_s26 = sld [smem:[#allocation3_spill]]  ;;  %v3846_v12 = vld [vmem:[%s5244_s4] ss:$0 sm:$0xff]  ;;  %vm2167_vm6 = vcmask 57344   ;;  %vm3371_vm7 = vcmask 1041409  }
   0x3   :  { %s5280_s20 = sld [smem:[#allocation4_spill]]  ;;  %v4697_v19 = vld [vmem:[%s5245_s2] sm:$0xff]  ;;  %s4532_s2 = smov 88   ;;  %vm3457_vm8 = vcmask 261127   ;;  %vm3461_vm9 = vcmask 253952  }
   0x4   :  { %s4534_s18 = smov 56   ;;  %s5275_s19 = smov 112  }
   0x5   :  { %s4536_s0 = smov 80   ;;  %s5269_s21 = smov 72  }
   0x6   :  { %s5267_s22 = smov 104   ;;  %s5265_s23 = smov 40  }
   0x7   :  { %s5263_s24 = smov 8   ;;  %s5261_s1 = smov 16  }
   0x8   :  { %v64_v0 = vld [vmem:[%s5279_s26] sm:$0xff]  ;;  %v65_v1 = vld [vmem:[%s5279_s26 + $0x8] sm:$0xff]  ;;  %v66_v2 = vld [vmem:[%s5279_s26 + $0x10] sm:$0xff]  ;;  %s5271_s25 = smov 24  }
   0x9   :  { %v4350_v3 = vpack.c.bf16 %v65_v1, %v64_v0  ;;  %v67_v4 = vld [vmem:[%s5279_s26 + $0x18] sm:$0xff]  ;;  %v58_v5 = vld [vmem:[%s5280_s20] sm:$0xff]  ;;  %v59_v9 = vld [vmem:[%s5280_s20 + $0x8] sm:$0xff]  ;;  %s5273_s20 = smov 48  }
   0xa   :  { %v4354_v6 = vpack.c.bf16 %v67_v4, %v66_v2  ;;  %v4654_v8 = vadd.f32 %v60_v7, %v58_v5  ;;  %v4661_v10 = vadd.f32 %v60_v7, %v59_v9 }
   0xb   :  { %4351 = vmatprep.subr.bf16.mxu0 %v4350_v3 }
   0xc   :  { %4353 = vmatpush3.bf16.msra.mxu0 %v4350_v3  ;;  %4083 = vmatprep.mubr.msk.f32.mxu0 %vm98_vm0, %v4654_v8 }
   0xd   :  { %4355 = vmatprep.subr.bf16.mxu0 %v4354_v6 }
  0x10   :  { %4357 = vmatpush3.bf16.msra.mxu0 %v4354_v6 }
  0x11   :  { %4106 = vmatprep.subr.mxu0 %v4528_v11 }
  0x13   :  { %4084 = vmatmul.mubr.msk.f32.vlgmr.msra.gmra.mrb[0].mxu0 %vm98_vm0, %v4661_v10 }
  0x14   :  { %4108 = vmatprep.mubr.msk.f32.mxu0 %vm4529_vm1, %v4528_v11 }
  0xe6   :  { %v4085_v13 = vpop.f32.mrb[0].mxu0 }
  0xe7   :  { %v171_v14 = vpop.f32.mrb[1].mxu0  ;;  %v4678_v16 = vadd.f32 %v4085_v13, %v3846_v12 }
  0xe8   :  { %v4674_v15 = vadd.f32 %v3846_v12, %v171_v14 }
  0xea   :  { %181 = vrot.lane.b32.xlu0 %v4674_v15, %s4530_s27 }
  0xee   :  { %259 = vrot.lane.b32.xlu0 %v4678_v16, %s4530_s27 }
 0x15c   :  { %v182_v17 = vpop.permute.xlu0 %181 }
 0x15d   :  { %4087 = vmatpush3.xpose.msk.msra.mxu1 %vm183_vm2, %v182_v17 }
 0x15e   :  { %4091 = vmatprep.subr.mxu1 %v4528_v11 }
 0x160   :  { %4089 = vmatmul.mubr.msk.f32.vlgmr.msra.gmra.mrb[0].mxu1 %vm183_vm2, %v4674_v15  ;;  %v260_v18 = vpop.permute.xlu0 %259 }
 0x161   :  { %4092 = vmatpush3.xpose.msk.msra.mxu1 %vm183_vm2, %v260_v18  ;;  %4093 = vmatprep.mubr.msk.f32.mxu1 %vm4529_vm1, %v4528_v11 }
 0x162   :  { %4096 = vmatprep.subr.mxu1 %v4528_v11 }
 0x164   :  { %4094 = vmatmul.mubr.msk.f32.vlgmr.msra.gmra.mrb[2].mxu1 %vm183_vm2, %v4678_v16 }
 0x165   :  { %4098 = vmatprep.mubr.msk.f32.mxu1 %vm4529_vm1, %v4528_v11 }
 0x233   :  { %v254_v20 = vpop.f32.mrb[0].mxu1 }
 0x234   :  { %v255_v21 = vadd.f32 %v254_v20, %v4697_v19  ;;  %v4090_v22 = vpop.f32.mrb[1].mxu1 }
 0x236   :  { %v335_v23 = vsel %vm183_vm2, %v255_v21, -inf }
 0x237   :  { %336 = vmax.xlane.f32.xlu1 %v335_v23  ;;  %v331_v24 = vpop.f32.mrb[2].mxu1 }
 0x238   :  { %v332_v25 = vadd.f32 %v331_v24, %v4697_v19  ;;  %v4095_v26 = vpop.f32.mrb[3].mxu1 }
 0x23a   :  { %v338_v27 = vsel %vm183_vm2, %v332_v25, -inf }
 0x23b   :  { %339 = vmax.xlane.f32.xlu1 %v338_v27 }
 0x24c   :  { %357 = vrot.lane.b32.xlu1 %v4674_v15, %s4531_s3 }
 0x250   :  { %433 = vrot.lane.b32.xlu1 %v4678_v16, %s4531_s3 }
 0x254   :  { %511 = vrot.lane.b32.xlu1 %v4674_v15, %s4532_s2 }
 0x258   :  { %589 = vrot.lane.b32.xlu1 %v4678_v16, %s4532_s2 }
 0x2c4   :  { %v337_v28 = vpop.xlane.xlu1 %336 }
 0x2c5   :  { %v341_v29 = vsub.f32 %v255_v21, %v337_v28 }
 0x2c7   :  { %v343_v30 = vmul.f32 1.442695, %v341_v29 }
 0x2c8   :  { %v340_v31 = vpop.xlane.xlu1 %339 }
 0x2c9   :  { %4448 = vpow2.f32 %v343_v30  ;;  %v342_v32 = vsub.f32 %v332_v25, %v340_v31 }
 0x2cb   :  { %v345_v33 = vmul.f32 1.442695, %v342_v32 }
 0x2cc   :  { %v358_v34 = vpop.permute.xlu1 %357 }
 0x2cd   :  { %4450 = vpow2.f32 %v345_v33  ;;  %4097 = vmatpush3.msra.mxu1 %v358_v34 }
 0x2ce   :  { %4101 = vmatprep.subr.mxu1 %v4528_v11 }
 0x2d0   :  { %v434_v35 = vpop.permute.xlu1 %433 }
 0x2d3   :  { %v4449_v36 = vpop.eup %4448 }
 0x2d4   :  { %v512_v37 = vpop.permute.xlu1 %511  ;;  %v347_v38 = vsel %vm183_vm2, %v4449_v36, 0.0 }
 0x2d5   :  { %348 = vadd.xlane.f32.xlu0 %v347_v38  ;;  %4107 = vmatpush3.xpose.msk.msra.mxu0 %vm183_vm2, %v512_v37 }
 0x2d6   :  { %4116 = vmatprep.subr.mxu0 %v4528_v11 }
 0x2d7   :  { %v4451_v39 = vpop.eup %4450 }
 0x2d8   :  { %v350_v40 = vsel %vm183_vm2, %v4451_v39, 0.0  ;;  %v590_v41 = vpop.permute.xlu1 %589 }
 0x2d9   :  { %351 = vadd.xlane.f32.xlu1 %v350_v40 }
 0x2ea   :  { %587 = vrot.lane.b32.xlu1 %v4678_v16, %s4533_s30 }
 0x2eb   :  { %509 = vrot.lane.b32.xlu0 %v4674_v15, %s4533_s30 }
 0x362   :  { %v349_v42 = vpop.xlane.xlu0 %348 }
 0x363   :  { %4452 = vrcp.f32 %v349_v42 }
 0x366   :  { %v352_v43 = vpop.xlane.xlu1 %351  ;;  %v510_v44 = vpop.permute.xlu0 %509 }
 0x367   :  { %4454 = vrcp.f32 %v352_v43  ;;  %4109 = vmatmul.mubr.msk.f32.vlgmr.msra.gmra.mrb[2].mxu0 %vm183_vm2, %v510_v44 }
 0x368   :  { %4118 = vmatprep.mubr.msk.f32.mxu0 %vm4529_vm1, %v4528_v11 }
 0x36a   :  { %v588_v49 = vpop.permute.xlu1 %587 }
 0x36d   :  { %v4453_v45 = vpop.eup %4452 }
 0x36e   :  { %v355_v46 = vmul.f32 %v4453_v45, %v4449_v36 }
 0x370   :  { %4099 = vmatmul.mubr.msk.f32.vlgmr.msra.gmra.mrb[4].mxu1 %vm183_vm2, %v355_v46 }
 0x371   :  { %v4455_v47 = vpop.eup %4454  ;;  %4102 = vmatpush3.msra.mxu1 %v434_v35  ;;  %4103 = vmatprep.mubr.msk.f32.mxu1 %vm4529_vm1, %v4528_v11 }
 0x372   :  { %v356_v48 = vmul.f32 %v4455_v47, %v4451_v39  ;;  %4111 = vmatprep.subr.mxu1 %v4528_v11 }
 0x374   :  { %4104 = vmatmul.mubr.msk.f32.vlgmr.msra.gmra.mrb[6].mxu1 %vm183_vm2, %v356_v48 }
 0x375   :  { %4113 = vmatprep.mubr.msk.f32.mxu1 %vm4529_vm1, %v4528_v11 }
 0x378   :  { %4112 = vmatpush3.xpose.msk.msra.mxu1 %vm183_vm2, %v590_v41 }
 0x379   :  { %4121 = vmatprep.subr.mxu1 %v4528_v11 }
 0x37b   :  { %4114 = vmatmul.mubr.msk.f32.vlgmr.msra.gmra.mrb[8].mxu1 %vm183_vm2, %v588_v49 }
 0x37c   :  { %4123 = vmatprep.mubr.msk.f32.mxu1 %vm4529_vm1, %v4528_v11 }
 0x43a   :  { %v583_v50 = vpop.f32.mrb[2].mxu0 }
 0x43b   :  { %v584_v51 = vadd.f32 %v583_v50, %v4697_v19  ;;  %v4110_v52 = vpop.f32.mrb[3].mxu0 }
 0x43d   :  { %v665_v53 = vsel %vm183_vm2, %v584_v51, -inf }
 0x43e   :  { %666 = vmax.xlane.f32.xlu1 %v665_v53 }
 0x443   :  { %v4737_v54 = vpop.f32.mrb[4].mxu1 }
 0x444   :  { %v4100_v55 = vpop.f32.mrb[5].mxu1 }
 0x447   :  { %v4739_v56 = vpop.f32.mrb[6].mxu1 }
 0x448   :  { %v4105_v57 = vpop.f32.mrb[7].mxu1 }
 0x44e   :  { %v661_v58 = vpop.f32.mrb[8].mxu1 }
 0x44f   :  { %v662_v59 = vadd.f32 %v661_v58, %v4697_v19  ;;  %v4115_v60 = vpop.f32.mrb[9].mxu1 }
 0x451   :  { %v668_v61 = vsel %vm183_vm2, %v662_v59, -inf }
 0x452   :  { %669 = vmax.xlane.f32.xlu0 %v668_v61 }
 0x468   :  { %763 = vrot.lane.b32.xlu0 %v4678_v16, %s4534_s18 }
 0x46c   :  { %839 = vrot.lane.b32.xlu0 %v4674_v15, %s5275_s19 }
 0x4cb   :  { %v667_v62 = vpop.xlane.xlu1 %666 }
 0x4cc   :  { %v671_v63 = vsub.f32 %v584_v51, %v667_v62 }
 0x4ce   :  { %v673_v0 = vmul.f32 1.442695, %v671_v63 }
 0x4d0   :  { %4456 = vpow2.f32 %v673_v0 }
 0x4da   :  { %v4457_v1 = vpop.eup %4456 }
 0x4db   :  { %v677_v2 = vsel %vm183_vm2, %v4457_v1, 0.0 }
 0x4dc   :  { %678 = vadd.xlane.f32.xlu1 %v677_v2 }
 0x4df   :  { %v670_v3 = vpop.xlane.xlu0 %669 }
 0x4e0   :  { %v672_v5 = vsub.f32 %v662_v59, %v670_v3 }
 0x4e2   :  { %v675_v6 = vmul.f32 1.442695, %v672_v5 }
 0x4e3   :  { %v764_v4 = vpop.permute.xlu0 %763 }
 0x4e4   :  { %4122 = vmatpush3.msra.mxu1 %v764_v4  ;;  %4458 = vpow2.f32 %v675_v6 }
 0x4e5   :  { %4131 = vmatprep.subr.mxu1 %v4528_v11 }
 0x4e7   :  { %v840_v20 = vpop.permute.xlu0 %839 }
 0x4ed   :  { %687 = vrot.lane.b32.xlu1 %v4674_v15, %s4534_s18 }
 0x4ee   :  { %v4459_v7 = vpop.eup %4458 }
 0x4ef   :  { %v680_v9 = vsel %vm183_vm2, %v4459_v7, 0.0 }
 0x4f1   :  { %841 = vrot.lane.b32.xlu1 %v4674_v15, %s4536_s0 }
 0x4f5   :  { %919 = vrot.lane.b32.xlu1 %v4678_v16, %s4536_s0 }
 0x519   :  { %681 = vadd.xlane.f32.xlu1 %v680_v9 }
 0x52a   :  { %917 = vrot.lane.b32.xlu1 %v4678_v16, %s5275_s19 }
 0x569   :  { %v679_v12 = vpop.xlane.xlu1 %678 }
 0x56a   :  { %4460 = vrcp.f32 %v679_v12 }
 0x56d   :  { %v688_v13 = vpop.permute.xlu1 %687 }
 0x56e   :  { %4117 = vmatpush3.msra.mxu0 %v688_v13 }
 0x56f   :  { %4126 = vmatprep.subr.mxu0 %v4528_v11 }
 0x571   :  { %v842_v18 = vpop.permute.xlu1 %841 }
 0x574   :  { %v4461_v14 = vpop.eup %4460 }
 0x575   :  { %v685_v17 = vmul.f32 %v4461_v14, %v4457_v1  ;;  %v920_v21 = vpop.permute.xlu1 %919 }
 0x577   :  { %4119 = vmatmul.mubr.msk.f32.vlgmr.msra.gmra.mrb[4].mxu0 %vm183_vm2, %v685_v17 }
 0x578   :  { %4127 = vmatpush3.xpose.msk.msra.mxu0 %vm183_vm2, %v842_v18  ;;  %4128 = vmatprep.mubr.msk.f32.mxu0 %vm4529_vm1, %v4528_v11 }
 0x579   :  { %4136 = vmatprep.subr.mxu0 %v4528_v11 }
 0x57b   :  { %4129 = vmatmul.mubr.msk.f32.vlgmr.msra.gmra.mrb[6].mxu0 %vm183_vm2, %v840_v20 }
 0x57c   :  { %4138 = vmatprep.mubr.msk.f32.mxu0 %vm4529_vm1, %v4528_v11 }
 0x5a6   :  { %v682_v22 = vpop.xlane.xlu1 %681 }
 0x5a7   :  { %4462 = vrcp.f32 %v682_v22 }
 0x5aa   :  { %v918_v25 = vpop.permute.xlu1 %917 }
 0x5b1   :  { %v4463_v23 = vpop.eup %4462 }
 0x5b2   :  { %v686_v24 = vmul.f32 %v4463_v23, %v4459_v7 }
 0x5b4   :  { %4124 = vmatmul.mubr.msk.f32.vlgmr.msra.gmra.mrb[10].mxu1 %vm183_vm2, %v686_v24 }
 0x5b5   :  { %4132 = vmatpush3.xpose.msk.msra.mxu1 %vm183_vm2, %v920_v21  ;;  %4133 = vmatprep.mubr.msk.f32.mxu1 %vm4529_vm1, %v4528_v11 }
 0x5b6   :  { %4141 = vmatprep.subr.mxu1 %v4528_v11 }
 0x5b8   :  { %4134 = vmatmul.mubr.msk.f32.vlgmr.msra.gmra.mrb[12].mxu1 %vm183_vm2, %v918_v25 }
 0x5b9   :  { %4143 = vmatprep.mubr.msk.f32.mxu1 %vm4529_vm1, %v4528_v11 }
 0x64a   :  { %v4775_v26 = vpop.f32.mrb[4].mxu0 }
 0x64b   :  { %v4120_v27 = vpop.f32.mrb[5].mxu0 }
 0x64e   :  { %v913_v28 = vpop.f32.mrb[6].mxu0 }
 0x64f   :  { %v914_v29 = vadd.f32 %v913_v28, %v4697_v19  ;;  %v4130_v30 = vpop.f32.mrb[7].mxu0 }
 0x651   :  { %v995_v31 = vsel %vm183_vm2, %v914_v29, -inf }
 0x652   :  { %996 = vmax.xlane.f32.xlu0 %v995_v31 }
 0x687   :  { %v4779_v32 = vpop.f32.mrb[10].mxu1 }
 0x688   :  { %v4125_v33 = vpop.f32.mrb[11].mxu1 }
 0x689   :  { %v71_v33 = vld [vmem:[%s5246_s5 + $0x10] sm:$0xff] }
 0x68b   :  { %v991_v34 = vpop.f32.mrb[12].mxu1 }
 0x68c   :  { %v992_v35 = vadd.f32 %v991_v34, %v4697_v19  ;;  %v4135_v36 = vpop.f32.mrb[13].mxu1 }
 0x68e   :  { %v998_v37 = vsel %vm183_vm2, %v992_v35, -inf }
 0x68f   :  { %999 = vmax.xlane.f32.xlu1 %v998_v37 }
 0x6a0   :  { %1017 = vrot.lane.b32.xlu1 %v4674_v15, %s5273_s20 }
 0x6a4   :  { %1171 = vrot.lane.b32.xlu1 %v4674_v15, %s5269_s21 }
 0x6a8   :  { %1249 = vrot.lane.b32.xlu1 %v4678_v16, %s5269_s21 }
 0x6ac   :  { %1247 = vrot.lane.b32.xlu1 %v4678_v16, %s5267_s22 }
 0x6df   :  { %v997_v38 = vpop.xlane.xlu0 %996 }
 0x6e0   :  { %v1001_v39 = vsub.f32 %v914_v29, %v997_v38 }
 0x6e2   :  { %v1003_v40 = vmul.f32 1.442695, %v1001_v39 }
 0x6e4   :  { %4464 = vpow2.f32 %v1003_v40 }
 0x6ee   :  { %v4465_v41 = vpop.eup %4464 }
 0x6ef   :  { %v1007_v42 = vsel %vm183_vm2, %v4465_v41, 0.0 }
 0x6f0   :  { %1008 = vadd.xlane.f32.xlu0 %v1007_v42 }
 0x706   :  { %1093 = vrot.lane.b32.xlu0 %v4678_v16, %s5273_s20 }
 0x71c   :  { %v1000_v43 = vpop.xlane.xlu1 %999 }
 0x71d   :  { %v1002_v44 = vsub.f32 %v992_v35, %v1000_v43  ;;  %v72_v35 = vld [vmem:[%s5246_s5 + $0x18] sm:$0xff] }
 0x71e   :  { %v4362_v36 = vpack.c.bf16 %v72_v35, %v71_v33  ;;  %v3877_v33 = vld [vmem:[%s5251_s8] ss:$0 sm:$0xff] }
 0x71f   :  { %v1005_v45 = vmul.f32 1.442695, %v1002_v44 }
 0x720   :  { %v1018_v46 = vpop.permute.xlu1 %1017 }
 0x721   :  { %4466 = vpow2.f32 %v1005_v45  ;;  %4137 = vmatpush3.msra.mxu0 %v1018_v46 }
 0x722   :  { %4146 = vmatprep.subr.mxu0 %v4528_v11 }
 0x724   :  { %v1172_v53 = vpop.permute.xlu1 %1171 }
 0x728   :  { %v1250_v59 = vpop.permute.xlu1 %1249 }
 0x72b   :  { %v4467_v47 = vpop.eup %4466 }
 0x72c   :  { %v1010_v48 = vsel %vm183_vm2, %v4467_v47, 0.0  ;;  %v1248_v61 = vpop.permute.xlu1 %1247 }
 0x72d   :  { %1011 = vadd.xlane.f32.xlu0 %v1010_v48 }
 0x743   :  { %1169 = vrot.lane.b32.xlu0 %v4674_v15, %s5267_s22 }
 0x77d   :  { %v1009_v49 = vpop.xlane.xlu0 %1008 }
 0x77e   :  { %4468 = vrcp.f32 %v1009_v49 }
 0x781   :  { %v1094_v50 = vpop.permute.xlu0 %1093 }
 0x782   :  { %4142 = vmatpush3.msra.mxu1 %v1094_v50 }
 0x783   :  { %4151 = vmatprep.subr.mxu1 %v4528_v11 }
 0x788   :  { %v4469_v51 = vpop.eup %4468 }
 0x789   :  { %v1015_v52 = vmul.f32 %v4469_v51, %v4465_v41 }
 0x78b   :  { %4139 = vmatmul.mubr.msk.f32.vlgmr.msra.gmra.mrb[8].mxu0 %vm183_vm2, %v1015_v52 }
 0x78c   :  { %4147 = vmatpush3.xpose.msk.msra.mxu0 %vm183_vm2, %v1172_v53  ;;  %4148 = vmatprep.mubr.msk.f32.mxu0 %vm4529_vm1, %v4528_v11 }
 0x78d   :  { %4156 = vmatprep.subr.mxu0 %v4528_v11 }
 0x7ba   :  { %v1012_v55 = vpop.xlane.xlu0 %1011 }
 0x7bb   :  { %4470 = vrcp.f32 %v1012_v55 }
 0x7be   :  { %v1170_v57 = vpop.permute.xlu0 %1169 }
 0x7bf   :  { %4149 = vmatmul.mubr.msk.f32.vlgmr.msra.gmra.mrb[10].mxu0 %vm183_vm2, %v1170_v57 }
 0x7c0   :  { %4158 = vmatprep.mubr.msk.f32.mxu0 %vm4529_vm1, %v4528_v11 }
 0x7c5   :  { %v4471_v58 = vpop.eup %4470 }
 0x7c6   :  { %v1016_v60 = vmul.f32 %v4471_v58, %v4467_v47 }
 0x7c8   :  { %4144 = vmatmul.mubr.msk.f32.vlgmr.msra.gmra.mrb[14].mxu1 %vm183_vm2, %v1016_v60 }
 0x7c9   :  { %4152 = vmatpush3.xpose.msk.msra.mxu1 %vm183_vm2, %v1250_v59  ;;  %4153 = vmatprep.mubr.msk.f32.mxu1 %vm4529_vm1, %v4528_v11 }
 0x7ca   :  { %4161 = vmatprep.subr.mxu1 %v4528_v11 }
 0x7cc   :  { %4154 = vmatmul.mubr.msk.f32.vlgmr.msra.gmra.mrb[16].mxu1 %vm183_vm2, %v1248_v61 }
 0x7cd   :  { %4163 = vmatprep.mubr.msk.f32.mxu1 %vm4529_vm1, %v4528_v11 }
 0x85e   :  { %v1089_v62 = vpop.f32.mrb[8].mxu0 }
 0x85f   :  { %v4140_v63 = vpop.f32.mrb[9].mxu0 }
 0x892   :  { %v1243_v0 = vpop.f32.mrb[10].mxu0 }
 0x893   :  { %v1244_v1 = vadd.f32 %v1243_v0, %v4697_v19  ;;  %v4150_v2 = vpop.f32.mrb[11].mxu0 }
 0x895   :  { %v1325_v3 = vsel %vm183_vm2, %v1244_v1, -inf }
 0x896   :  { %1326 = vmax.xlane.f32.xlu0 %v1325_v3 }
 0x89b   :  { %v1165_v4 = vpop.f32.mrb[14].mxu1 }
 0x89c   :  { %v4145_v5 = vpop.f32.mrb[15].mxu1 }
 0x89f   :  { %v1321_v6 = vpop.f32.mrb[16].mxu1 }
 0x8a0   :  { %v1322_v7 = vadd.f32 %v1321_v6, %v4697_v19  ;;  %v4155_v9 = vpop.f32.mrb[17].mxu1 }
 0x8a2   :  { %v1328_v12 = vsel %vm183_vm2, %v1322_v7, -inf }
 0x8a3   :  { %1329 = vmax.xlane.f32.xlu1 %v1328_v12  ;;  %v78_v12 = vld [vmem:[%s5248_s9 + $0x10] sm:$0xff] }
 0x8b4   :  { %1347 = vrot.lane.b32.xlu1 %v4674_v15, %s5265_s23 }
 0x8b8   :  { %1501 = vrot.lane.b32.xlu1 %v4775_v26, %s5263_s24 }
 0x8bc   :  { %1503 = vrot.lane.b32.xlu1 %v4779_v32, %s5263_s24  ;;  %v70_v32 = vld [vmem:[%s5246_s5 + $0x8] sm:$0xff] }
 0x8c0   :  { %1511 = vrot.lane.b32.xlu1 %v1165_v4, %s5261_s1 }
 0x923   :  { %v1327_v13 = vpop.xlane.xlu0 %1326 }
 0x924   :  { %v1331_v19 = vsub.f32 %v1244_v1, %v1327_v13  ;;  %v79_v13 = vld [vmem:[%s5248_s9 + $0x18] sm:$0xff] }
 0x926   :  { %v1333_v14 = vmul.f32 1.442695, %v1331_v19  ;;  %v4370_v19 = vpack.c.bf16 %v79_v13, %v78_v12 }
 0x928   :  { %4472 = vpow2.f32 %v1333_v14  ;;  %v81_v14 = vld [vmem:[%s5249_s11] sm:$0xff] }
 0x930   :  { %v1330_v17 = vpop.xlane.xlu1 %1329 }
 0x931   :  { %v1332_v18 = vsub.f32 %v1322_v7, %v1330_v17  ;;  %v77_v7 = vld [vmem:[%s5248_s9 + $0x8] sm:$0xff] }
 0x932   :  { %v4473_v20 = vpop.eup %4472  ;;  %v82_v17 = vld [vmem:[%s5249_s11 + $0x8] sm:$0xff] }
 0x933   :  { %v1335_v21 = vmul.f32 1.442695, %v1332_v18  ;;  %v1337_v15 = vsel %vm183_vm2, %v4473_v20, 0.0  ;;  %v83_v18 = vld [vmem:[%s5249_s11 + $0x10] sm:$0xff] }
 0x934   :  { %v1348_v22 = vpop.permute.xlu1 %1347  ;;  %1338 = vadd.xlane.f32.xlu0 %v1337_v15 }
 0x935   :  { %4474 = vpow2.f32 %v1335_v21  ;;  %4157 = vmatpush3.msra.mxu0 %v1348_v22  ;;  %v84_v21 = vld [vmem:[%s5249_s11 + $0x18] sm:$0xff]  ;;  %v85_v22 = vld [vmem:[%s5249_s11 + $0x20] sm:$0xff] }
 0x936   :  { %v4378_v15 = vpack.c.bf16 %v84_v21, %v83_v18  ;;  %v3884_v21 = vld [vmem:[%s5254_s13] ss:$0 sm:$0xff] }
 0x938   :  { %v1502_v41 = vpop.permute.xlu1 %1501 }
 0x939   :  { %v1523_v43 = vsel %vm183_vm2, %v4737_v54, %v1502_v41  ;;  %v3873_v54 = vld [vmem:[%s5247_s6] ss:$0 sm:$0xff]  ;;  %v88_v41 = vld [vmem:[%s5249_s11 + $0x38] sm:$0xff] }
 0x93c   :  { %v1504_v47 = vpop.permute.xlu1 %1503 }
 0x93d   :  { %v1524_v49 = vsel %vm183_vm2, %v4739_v56, %v1504_v47 }
 0x93f   :  { %v4475_v23 = vpop.eup %4474 }
 0x940   :  { %v1340_v24 = vsel %vm183_vm2, %v4475_v23, 0.0  ;;  %v1512_v48 = vpop.permute.xlu1 %1511 }
 0x941   :  { %1341 = vadd.xlane.f32.xlu0 %v1340_v24  ;;  %v1527_v50 = vsel %vm1525_vm4, %v1524_v49, %v1512_v48 }
 0x957   :  { %1423 = vrot.lane.b32.xlu0 %v4678_v16, %s5265_s23  ;;  %v69_v16 = vld [vmem:[%s5246_s5] sm:$0xff] }
 0x958   :  { %v4358_v34 = vpack.c.bf16 %v70_v32, %v69_v16  ;;  %v3876_v16 = vld [vmem:[%s5250_s7] ss:$0 sm:$0xff] }
 0x95a   :  { %4359 = vmatprep.subr.bf16.mxu0 %v4358_v34 }
 0x95b   :  { %1509 = vrot.lane.b32.xlu0 %v1089_v62, %s5261_s1  ;;  %s5288_s1 = smov 24  }
 0x9c1   :  { %v1339_v25 = vpop.xlane.xlu0 %1338 }
 0x9c2   :  { %4476 = vrcp.f32 %v1339_v25 }
 0x9cc   :  { %v4477_v26 = vpop.eup %4476 }
 0x9cd   :  { %v1345_v27 = vmul.f32 %v4477_v26, %v4473_v20  ;;  %v4374_v20 = vpack.c.bf16 %v82_v17, %v81_v14 }
 0x9ce   :  { %v1342_v28 = vpop.xlane.xlu0 %1341 }
 0x9cf   :  { %4478 = vrcp.f32 %v1342_v28  ;;  %4159 = vmatmul.mubr.msk.f32.vlgmr.msra.gmra.mrb[12].mxu0 %vm183_vm2, %v1345_v27 }
 0x9d0   :  { %4361 = vmatpush3.bf16.msra.mxu0 %v4358_v34 }
 0x9d1   :  { %4363 = vmatprep.subr.bf16.mxu0 %v4362_v36 }
 0x9d2   :  { %v1424_v29 = vpop.permute.xlu0 %1423 }
 0x9d3   :  { %4162 = vmatpush3.msra.mxu1 %v1424_v29 }
 0x9d4   :  { %4365 = vmatpush3.bf16.msra.mxu0 %v4362_v36 }
 0x9d5   :  { %4375 = vmatprep.subr.bf16.mxu0 %v4374_v20 }
 0x9d6   :  { %v1510_v42 = vpop.permute.xlu0 %1509 }
 0x9d7   :  { %v1526_v44 = vsel %vm1525_vm4, %v1523_v43, %v1510_v42  ;;  %v3878_v43 = vld [vmem:[%s5252_s10] ss:$0 sm:$0xff] }
 0x9d9   :  { %v4479_v30 = vpop.eup %4478 }
 0x9da   :  { %v1346_v31 = vmul.f32 %v4479_v30, %v4475_v23  ;;  %v86_v23 = vld [vmem:[%s5249_s11 + $0x28] sm:$0xff] }
 0x9db   :  { %v4382_v24 = vpack.c.bf16 %v86_v23, %v85_v22 }
 0x9dc   :  { %4164 = vmatmul.mubr.msk.f32.vlgmr.msra.gmra.mrb[18].mxu1 %vm183_vm2, %v1346_v31 }
 0xaa2   :  { %v1419_v37 = vpop.f32.mrb[12].mxu0 }
 0xaa3   :  { %1517 = vrot.lane.b32.xlu0 %v1419_v37, %s5271_s25  ;;  %v4160_v38 = vpop.f32.mrb[13].mxu0 }
 0xaaf   :  { %v1495_v39 = vpop.f32.mrb[18].mxu1 }
 0xab0   :  { %1519 = vrot.lane.b32.xlu1 %v1495_v39, %s5271_s25  ;;  %v4165_v40 = vpop.f32.mrb[19].mxu1 }
 0xab1   :  { %v87_v40 = vld [vmem:[%s5249_s11 + $0x30] sm:$0xff] }
 0xab2   :  { %v4386_v42 = vpack.c.bf16 %v88_v41, %v87_v40 }
 0xb15   :  { %v1518_v45 = vpop.permute.xlu0 %1517 }
 0xb16   :  { %v1529_v46 = vsel %vm1528_vm3, %v1526_v44, %v1518_v45 }
 0xb17   :  { %4174 = vmatprep.mubr.msk.f32.mxu0 %vm98_vm0, %v1529_v46 }
 0xb22   :  { %v1520_v51 = vpop.permute.xlu1 %1519 }
 0xb23   :  { %v1530_v52 = vsel %vm1528_vm3, %v1527_v50, %v1520_v51  ;;  %v3881_v50 = vld [vmem:[%s5253_s12] ss:$0 sm:$0xff] }
 0xb24   :  { %4175 = vmatmul.mubr.msk.f32.vlgmr.msra.gmra.mrb[14].mxu0 %vm98_vm0, %v1530_v52 }
 0xb25   :  { %4377 = vmatpush3.bf16.msra.mxu0 %v4374_v20 }
 0xb26   :  { %4379 = vmatprep.subr.bf16.mxu0 %v4378_v15 }
 0xb29   :  { %4381 = vmatpush3.bf16.msra.mxu0 %v4378_v15 }
 0xb2a   :  { %4383 = vmatprep.subr.bf16.mxu0 %v4382_v24 }
 0xb2d   :  { %4385 = vmatpush3.bf16.msra.mxu0 %v4382_v24  ;;  %v3885_v24 = vld [vmem:[%s5255_s14] ss:$0 sm:$0xff] }
 0xb2e   :  { %4387 = vmatprep.subr.bf16.mxu0 %v4386_v42 }
 0xb31   :  { %4389 = vmatpush3.bf16.msra.mxu0 %v4386_v42 }
 0xb32   :  { %4228 = vmatprep.subr.mxu0 %v4528_v11 }
 0xbf7   :  { %v4176_v53 = vpop.f32.mrb[14].mxu0 }
 0xbf8   :  { %v1615_v55 = vadd.f32 %v4176_v53, %v3873_v54  ;;  %v1609_v57 = vpop.f32.mrb[15].mxu0 }
 0xbf9   :  { %v1610_v58 = vadd.f32 %v3873_v54, %v1609_v57 }
 0xbfa   :  { %v1619_v59 = vadd.f32 %v1615_v55, %v4661_v10 }
 0xbfb   :  { %v1618_v60 = vadd.f32 %v1610_v58, %v4654_v8  ;;  %v76_v8 = vld [vmem:[%s5248_s9] sm:$0xff] }
 0xbfc   :  { %v1623_v56 = vsel %vm98_vm0, %v1619_v59, 0.0  ;;  %v4366_v9 = vpack.c.bf16 %v77_v7, %v76_v8  ;;  %v3888_v8 = vld [vmem:[%s5279_s26 + $0x30] sm:$0xff]  ;;  %v3889_v7 = vld [vmem:[%s5279_s26 + $0x38] sm:$0xff] }
 0xbfd   :  { %1624 = vadd.xlane.f32.xlu1 %v1623_v56  ;;  %v1620_v61 = vsel %vm98_vm0, %v1618_v60, 0.0 }
 0xbfe   :  { %1621 = vadd.xlane.f32.xlu0 %v1620_v61  ;;  %4367 = vmatprep.subr.bf16.mxu1 %v4366_v9 }
 0xbff   :  { %4369 = vmatpush3.bf16.msra.mxu1 %v4366_v9  ;;  %v4394_v9 = vpack.c.bf16 %v3889_v7, %v3888_v8 }
 0xc00   :  { %4371 = vmatprep.subr.bf16.mxu1 %v4370_v19 }
 0xc03   :  { %4373 = vmatpush3.bf16.msra.mxu1 %v4370_v19 }
 0xc8a   :  { %v1625_v62 = vpop.xlane.xlu1 %1624 }
 0xc8b   :  { %v1628_v63 = vmul.f32 0.03125, %v1625_v62  ;;  %v1622_v0 = vpop.xlane.xlu0 %1621 }
 0xc8c   :  { %v1627_v1 = vmul.f32 0.03125, %v1622_v0 }
 0xc8d   :  { %v1630_v2 = vsub.f32 %v1619_v59, %v1628_v63 }
 0xc8e   :  { %v1629_v3 = vsub.f32 %v1618_v60, %v1627_v1 }
 0xc8f   :  { %v1632_v6 = vmul.f32 %v1630_v2, %v1630_v2 }
 0xc90   :  { %v1631_v4 = vmul.f32 %v1629_v3, %v1629_v3 }
 0xc91   :  { %v1636_v10 = vsel %vm98_vm0, %v1632_v6, 0.0  ;;  %v3887_v6 = vld [vmem:[%s5279_s26 + $0x28] sm:$0xff] }
 0xc92   :  { %v1633_v5 = vsel %vm98_vm0, %v1631_v4, 0.0 }
 0xc93   :  { %1634 = vadd.xlane.f32.xlu0 %v1633_v5  ;;  %v3886_v5 = vld [vmem:[%s5279_s26 + $0x20] sm:$0xff] }
 0xc97   :  { %1637 = vadd.xlane.f32.xlu0 %v1636_v10  ;;  %v4390_v10 = vpack.c.bf16 %v3887_v6, %v3886_v5 }
 0xc99   :  { %4391 = vmatprep.subr.bf16.mxu1 %v4390_v10 }
 0xd20   :  { %v1635_v25 = vpop.xlane.xlu0 %1634 }
 0xd21   :  { %v1639_v26 = vmul.f32 0.03125, %v1635_v25 }
 0xd23   :  { %v1641_v27 = vadd.f32 1e-05, %v1639_v26 }
 0xd24   :  { %v1638_v28 = vpop.xlane.xlu0 %1637 }
 0xd25   :  { %4480 = vrsqrt.f32 %v1641_v27  ;;  %v1640_v29 = vmul.f32 0.03125, %v1638_v28 }
 0xd27   :  { %v1642_v30 = vadd.f32 1e-05, %v1640_v29  ;;  %v3914_v29 = vld [vmem:[%s5244_s4 + $0x1] ss:$0 sm:$0xff]  ;;  %s5281_s4 = smov 112  }
 0xd29   :  { %4482 = vrsqrt.f32 %v1642_v30 }
 0xd2f   :  { %v4481_v31 = vpop.eup %4480 }
 0xd30   :  { %v1645_v32 = vmul.f32 %v4481_v31, %v1629_v3 }
 0xd32   :  { %v1653_v34 = vmul.f32 %v3876_v16, %v1645_v32 }
 0xd33   :  { %v4483_v35 = vpop.eup %4482 }
 0xd34   :  { %v1646_v36 = vmul.f32 %v4483_v35, %v1630_v2  ;;  %v1661_v37 = vadd.f32 %v3877_v33, %v1653_v34 }
 0xd36   :  { %v1654_v38 = vmul.f32 %v3876_v16, %v1646_v36  ;;  %4185 = vmatprep.mubr.msk.f32.mxu1 %vm98_vm0, %v1661_v37 }
 0xd38   :  { %v1662_v39 = vadd.f32 %v3877_v33, %v1654_v38 }
 0xd3a   :  { %4186 = vmatmul.mubr.msk.f32.vlgmr.msra.gmra.mrb[20].mxu1 %vm98_vm0, %v1662_v39 }
 0xd3b   :  { %4393 = vmatpush3.bf16.msra.mxu1 %v4390_v10 }
 0xd3c   :  { %4395 = vmatprep.subr.bf16.mxu1 %v4394_v9 }
 0xd3f   :  { %4397 = vmatpush3.bf16.msra.mxu1 %v4394_v9 }
 0xd40   :  { %4218 = vmatprep.subr.mxu1 %v4528_v11 }
 0xe0d   :  { %v4187_v44 = vpop.f32.mrb[20].mxu1 }
 0xe0e   :  { %v1747_v45 = vadd.f32 %v4187_v44, %v3878_v43  ;;  %v1741_v46 = vpop.f32.mrb[21].mxu1 }
 0xe0f   :  { %v1742_v47 = vadd.f32 %v3878_v43, %v1741_v46 }
 0xe10   :  { %v1751_v49 = vmax.f32 %v1747_v45, 0.0 }
 0xe11   :  { %v1750_v48 = vmax.f32 %v1742_v47, 0.0 }
 0xe13   :  { %4204 = vmatprep.mubr.msk.f32.mxu0 %vm1758_vm5, %v1750_v48 }
 0xe14   :  { %4205 = vmatmul.mubr.msk.f32.vlgmr.msra.gmra.mrb[16].mxu0 %vm1758_vm5, %v1751_v49 }
 0xe15   :  { %4230 = vmatprep.mubr.msk.f32.mxu0 %vm4529_vm1, %v4528_v11 }
 0xee7   :  { %v4206_v51 = vpop.f32.mrb[16].mxu0 }
 0xee8   :  { %v1837_v52 = vadd.f32 %v4206_v51, %v3881_v50  ;;  %v1831_v54 = vpop.f32.mrb[17].mxu0 }
 0xee9   :  { %v1832_v53 = vadd.f32 %v3881_v50, %v1831_v54 }
 0xeea   :  { %v1841_v55 = vadd.f32 %v1837_v52, %v1662_v39 }
 0xeeb   :  { %v1840_v57 = vadd.f32 %v1832_v53, %v1661_v37 }
 0xeec   :  { %v1845_v58 = vsel %vm98_vm0, %v1841_v55, 0.0 }
 0xeed   :  { %1846 = vadd.xlane.f32.xlu0 %v1845_v58  ;;  %v1842_v59 = vsel %vm98_vm0, %v1840_v57, 0.0 }
 0xeee   :  { %1843 = vadd.xlane.f32.xlu1 %v1842_v59 }
 0xf7a   :  { %v1847_v60 = vpop.xlane.xlu0 %1846 }
 0xf7b   :  { %v1849_v56 = vmul.f32 0.03125, %v1847_v60  ;;  %v1844_v61 = vpop.xlane.xlu1 %1843 }
 0xf7c   :  { %v1848_v62 = vmul.f32 0.03125, %v1844_v61 }
 0xf7d   :  { %v1851_v63 = vsub.f32 %v1841_v55, %v1849_v56 }
 0xf7e   :  { %v1850_v0 = vsub.f32 %v1840_v57, %v1848_v62 }
 0xf7f   :  { %v1853_v1 = vmul.f32 %v1851_v63, %v1851_v63 }
 0xf80   :  { %v1852_v2 = vmul.f32 %v1850_v0, %v1850_v0 }
 0xf81   :  { %v1857_v3 = vsel %vm98_vm0, %v1853_v1, 0.0 }
 0xf82   :  { %1858 = vadd.xlane.f32.xlu0 %v1857_v3  ;;  %v1854_v4 = vsel %vm98_vm0, %v1852_v2, 0.0 }
 0xf83   :  { %1855 = vadd.xlane.f32.xlu1 %v1854_v4 }
0x100f   :  { %v1859_v12 = vpop.xlane.xlu0 %1858 }
0x1010   :  { %v1861_v13 = vmul.f32 0.03125, %v1859_v12  ;;  %v1856_v19 = vpop.xlane.xlu1 %1855 }
0x1011   :  { %v1860_v14 = vmul.f32 0.03125, %v1856_v19 }
0x1012   :  { %v1863_v17 = vadd.f32 1e-05, %v1861_v13 }
0x1013   :  { %v1862_v18 = vadd.f32 1e-05, %v1860_v14 }
0x1014   :  { %4484 = vrsqrt.f32 %v1863_v17 }
0x1015   :  { %4486 = vrsqrt.f32 %v1862_v18 }
0x101e   :  { %v4485_v20 = vpop.eup %4484 }
0x101f   :  { %v4487_v15 = vpop.eup %4486  ;;  %v1867_v22 = vmul.f32 %v4485_v20, %v1851_v63 }
0x1020   :  { %v1866_v23 = vmul.f32 %v4487_v15, %v1850_v0 }
0x1021   :  { %v1875_v25 = vmul.f32 %v3884_v21, %v1867_v22 }
0x1022   :  { %v1874_v26 = vmul.f32 %v3884_v21, %v1866_v23 }
0x1023   :  { %v4946_v28 = vadd.f32 %v3885_v24, %v1875_v25 }
0x1024   :  { %v4944_v27 = vadd.f32 %v3885_v24, %v1874_v26 }
0x1026   :  { %4215 = vmatprep.mubr.msk.f32.mxu1 %vm98_vm0, %v4944_v27 }
0x1027   :  { %4216 = vmatmul.mubr.msk.f32.vlgmr.msra.gmra.mrb[22].mxu1 %vm98_vm0, %v4946_v28 }
0x1028   :  { %4220 = vmatprep.mubr.msk.f32.mxu1 %vm4529_vm1, %v4528_v11 }
0x10fa   :  { %v4217_v30 = vpop.f32.mrb[22].mxu1 }
0x10fb   :  { %v4957_v31 = vadd.f32 %v4217_v30, %v3914_v29  ;;  %v2002_v16 = vpop.f32.mrb[23].mxu1 }
0x10fc   :  { %v4959_v32 = vadd.f32 %v3914_v29, %v2002_v16 }
0x10fd   :  { %2091 = vrot.lane.b32.xlu0 %v4957_v31, %s4530_s27  ;;  %v4976_v36 = vrot.slane %v4957_v31, 7 }
0x10fe   :  { %2013 = vrot.lane.b32.xlu1 %v4959_v32, %s4530_s27  ;;  %v4967_v34 = vrot.slane %v4959_v32, 7  ;;  %s5282_s27 = smov 48  }
0x116f   :  { %v2092_v35 = vpop.permute.xlu0 %2091 }
0x1170   :  { %v2014_v33 = vpop.permute.xlu1 %2013 }
0x1171   :  { %4219 = vmatpush3.xpose.msk.msra.mxu1 %vm183_vm2, %v2014_v33 }
0x1172   :  { %4223 = vmatprep.subr.mxu1 %v4528_v11 }
0x1174   :  { %4221 = vmatmul.mubr.msk.f32.vlgmr.msra.gmra.mrb[24].mxu1 %vm183_vm2, %v4967_v34 }
0x1175   :  { %4224 = vmatpush3.xpose.msk.msra.mxu1 %vm183_vm2, %v2092_v35  ;;  %4225 = vmatprep.mubr.msk.f32.mxu1 %vm4529_vm1, %v4528_v11 }
0x1176   :  { %4233 = vmatprep.subr.mxu1 %v4528_v11 }
0x1178   :  { %4226 = vmatmul.mubr.msk.f32.vlgmr.msra.gmra.mrb[26].mxu1 %vm183_vm2, %v4976_v36 }
0x1179   :  { %4235 = vmatprep.mubr.msk.f32.mxu1 %vm4529_vm1, %v4528_v11 }
0x1247   :  { %v2085_v37 = vpop.f32.mrb[24].mxu1 }
0x1248   :  { %v4222_v38 = vpop.f32.mrb[25].mxu1  ;;  %v2168_v39 = vsel %vm2167_vm6, %v2085_v37, -inf }
0x1249   :  { %2169 = vmax.xlane.f32.xlu0 %v2168_v39 }
0x124b   :  { %v2163_v40 = vpop.f32.mrb[26].mxu1 }
0x124c   :  { %v4227_v41 = vpop.f32.mrb[27].mxu1  ;;  %v2171_v42 = vsel %vm2167_vm6, %v2163_v40, -inf }
0x124d   :  { %2172 = vmax.xlane.f32.xlu1 %v2171_v42 }
0x125e   :  { %2266 = vrot.lane.b32.xlu1 %v4957_v31, %s4531_s3 }
0x125f   :  { %2190 = vrot.lane.b32.xlu0 %v4959_v32, %s4531_s3  ;;  %s5283_s3 = smov 72  }
0x1262   :  { %2422 = vrot.lane.b32.xlu1 %v4957_v31, %s4532_s2 }
0x1266   :  { %2344 = vrot.lane.b32.xlu1 %v4959_v32, %s4532_s2  ;;  %s5284_s2 = smov 104  }
0x12d6   :  { %v2170_v43 = vpop.xlane.xlu0 %2169 }
0x12d7   :  { %v2174_v44 = vsub.f32 %v2085_v37, %v2170_v43 }
0x12d9   :  { %v2176_v45 = vmul.f32 1.442695, %v2174_v44 }
0x12da   :  { %v2191_v46 = vpop.permute.xlu0 %2190  ;;  %v2173_v47 = vpop.xlane.xlu1 %2172 }
0x12db   :  { %4488 = vpow2.f32 %v2176_v45  ;;  %v2175_v48 = vsub.f32 %v2163_v40, %v2173_v47  ;;  %4229 = vmatpush3.msra.mxu0 %v2191_v46 }
0x12dc   :  { %4238 = vmatprep.subr.mxu0 %v4528_v11 }
0x12dd   :  { %v2178_v49 = vmul.f32 1.442695, %v2175_v48 }
0x12de   :  { %v2267_v50 = vpop.permute.xlu1 %2266 }
0x12df   :  { %4490 = vpow2.f32 %v2178_v49  ;;  %4234 = vmatpush3.msra.mxu1 %v2267_v50 }
0x12e0   :  { %4243 = vmatprep.subr.mxu1 %v4528_v11 }
0x12e2   :  { %v2423_v55 = vpop.permute.xlu1 %2422 }
0x12e5   :  { %v4489_v51 = vpop.eup %4488 }
0x12e6   :  { %v2180_v52 = vsel %vm2167_vm6, %v4489_v51, 0.0  ;;  %v2345_v57 = vpop.permute.xlu1 %2344 }
0x12e7   :  { %2181 = vadd.xlane.f32.xlu0 %v2180_v52 }
0x12e9   :  { %v4491_v54 = vpop.eup %4490 }
0x12ea   :  { %v2183_v53 = vsel %vm2167_vm6, %v4491_v54, 0.0 }
0x12eb   :  { %2184 = vadd.xlane.f32.xlu1 %v2183_v53 }
0x12fc   :  { %2342 = vrot.lane.b32.xlu1 %v4967_v34, %s4533_s30 }
0x12fd   :  { %2420 = vrot.lane.b32.xlu0 %v4976_v36, %s4533_s30  ;;  %s5285_s30 = smov 40  }
0x1374   :  { %v2182_v58 = vpop.xlane.xlu0 %2181 }
0x1375   :  { %4492 = vrcp.f32 %v2182_v58 }
0x1378   :  { %v2185_v59 = vpop.xlane.xlu1 %2184  ;;  %v2421_v0 = vpop.permute.xlu0 %2420 }
0x1379   :  { %4494 = vrcp.f32 %v2185_v59 }
0x137c   :  { %v2343_v63 = vpop.permute.xlu1 %2342 }
0x137f   :  { %v4493_v60 = vpop.eup %4492 }
0x1380   :  { %v2188_v56 = vmul.f32 %v4493_v60, %v4489_v51 }
0x1382   :  { %4231 = vmatmul.mubr.msk.f32.vlgmr.msra.gmra.mrb[18].mxu0 %vm183_vm2, %v2188_v56 }
0x1383   :  { %v4495_v61 = vpop.eup %4494  ;;  %4239 = vmatpush3.xpose.msk.msra.mxu0 %vm183_vm2, %v2345_v57  ;;  %4240 = vmatprep.mubr.msk.f32.mxu0 %vm4529_vm1, %v4528_v11 }
0x1384   :  { %v2189_v62 = vmul.f32 %v4495_v61, %v4491_v54  ;;  %4248 = vmatprep.subr.mxu0 %v4528_v11 }
0x1386   :  { %4236 = vmatmul.mubr.msk.f32.vlgmr.msra.gmra.mrb[28].mxu1 %vm183_vm2, %v2189_v62  ;;  %4241 = vmatmul.mubr.msk.f32.vlgmr.msra.gmra.mrb[20].mxu0 %vm183_vm2, %v2343_v63 }
0x1387   :  { %4244 = vmatpush3.xpose.msk.msra.mxu1 %vm183_vm2, %v2423_v55  ;;  %4245 = vmatprep.mubr.msk.f32.mxu1 %vm4529_vm1, %v4528_v11 }
0x1388   :  { %4253 = vmatprep.subr.mxu1 %v4528_v11  ;;  %4250 = vmatprep.mubr.msk.f32.mxu0 %vm4529_vm1, %v4528_v11 }
0x138a   :  { %4246 = vmatmul.mubr.msk.f32.vlgmr.msra.gmra.mrb[30].mxu1 %vm183_vm2, %v2421_v0 }
0x138b   :  { %4255 = vmatprep.mubr.msk.f32.mxu1 %vm4529_vm1, %v4528_v11 }
0x1455   :  { %v5017_v1 = vpop.f32.mrb[18].mxu0 }
0x1456   :  { %v4232_v2 = vpop.f32.mrb[19].mxu0 }
0x1459   :  { %v5019_v3 = vpop.f32.mrb[28].mxu1  ;;  %v2416_v4 = vpop.f32.mrb[20].mxu0 }
0x145a   :  { %v4237_v5 = vpop.f32.mrb[29].mxu1  ;;  %v4242_v6 = vpop.f32.mrb[21].mxu0  ;;  %v2498_v10 = vsel %vm2167_vm6, %v2416_v4, -inf }
0x145b   :  { %2499 = vmax.xlane.f32.xlu1 %v2498_v10 }
0x145d   :  { %v2494_v8 = vpop.f32.mrb[30].mxu1 }
0x145e   :  { %v4247_v7 = vpop.f32.mrb[31].mxu1  ;;  %v2501_v9 = vsel %vm2167_vm6, %v2494_v8, -inf }
0x145f   :  { %2502 = vmax.xlane.f32.xlu0 %v2501_v9 }
0x146c   :  { %2596 = vrot.lane.b32.xlu1 %v4957_v31, %s4534_s18 }
0x1470   :  { %2752 = vrot.lane.b32.xlu1 %v4957_v31, %s4536_s0 }
0x1474   :  { %2674 = vrot.lane.b32.xlu1 %v4959_v32, %s4536_s0  ;;  %s5287_s0 = smov 16  }
0x1475   :  { %2520 = vrot.lane.b32.xlu0 %v4959_v32, %s4534_s18  ;;  %s5286_s18 = smov 8  }
0x1478   :  { %2672 = vrot.lane.b32.xlu1 %v4967_v34, %s5281_s4 }
0x14e8   :  { %v2500_v12 = vpop.xlane.xlu1 %2499 }
0x14e9   :  { %v2504_v13 = vsub.f32 %v2416_v4, %v2500_v12 }
0x14eb   :  { %v2506_v19 = vmul.f32 1.442695, %v2504_v13 }
0x14ec   :  { %v2597_v14 = vpop.permute.xlu1 %2596  ;;  %v2503_v17 = vpop.xlane.xlu0 %2502 }
0x14ed   :  { %4496 = vpow2.f32 %v2506_v19  ;;  %v2505_v18 = vsub.f32 %v2494_v8, %v2503_v17  ;;  %4254 = vmatpush3.msra.mxu1 %v2597_v14 }
0x14ee   :  { %4263 = vmatprep.subr.mxu1 %v4528_v11 }
0x14ef   :  { %v2508_v20 = vmul.f32 1.442695, %v2505_v18 }
0x14f0   :  { %v2521_v21 = vpop.permute.xlu0 %2520  ;;  %v2753_v29 = vpop.permute.xlu1 %2752 }
0x14f1   :  { %4498 = vpow2.f32 %v2508_v20  ;;  %4249 = vmatpush3.msra.mxu0 %v2521_v21 }
0x14f2   :  { %4258 = vmatprep.subr.mxu0 %v4528_v11 }
0x14f4   :  { %v2675_v16 = vpop.permute.xlu1 %2674 }
0x14f7   :  { %v4497_v15 = vpop.eup %4496 }
0x14f8   :  { %v2510_v22 = vsel %vm2167_vm6, %v4497_v15, 0.0  ;;  %v2673_v38 = vpop.permute.xlu1 %2672 }
0x14f9   :  { %2511 = vadd.xlane.f32.xlu0 %v2510_v22 }
0x14fb   :  { %v4499_v23 = vpop.eup %4498 }
0x14fc   :  { %v2513_v24 = vsel %vm2167_vm6, %v4499_v23, 0.0 }
0x14fd   :  { %2514 = vadd.xlane.f32.xlu0 %v2513_v24 }
0x1513   :  { %2750 = vrot.lane.b32.xlu0 %v4976_v36, %s5281_s4 }
0x1586   :  { %v2512_v25 = vpop.xlane.xlu0 %2511 }
0x1587   :  { %4500 = vrcp.f32 %v2512_v25 }
0x158a   :  { %v2515_v26 = vpop.xlane.xlu0 %2514 }
0x158b   :  { %4502 = vrcp.f32 %v2515_v26 }
0x158e   :  { %v2751_v39 = vpop.permute.xlu0 %2750 }
0x1591   :  { %v4501_v30 = vpop.eup %4500 }
0x1592   :  { %v2518_v33 = vmul.f32 %v4501_v30, %v4497_v15 }
0x1594   :  { %4251 = vmatmul.mubr.msk.f32.vlgmr.msra.gmra.mrb[22].mxu0 %vm183_vm2, %v2518_v33 }
0x1595   :  { %v4503_v35 = vpop.eup %4502  ;;  %4259 = vmatpush3.xpose.msk.msra.mxu0 %vm183_vm2, %v2675_v16  ;;  %4260 = vmatprep.mubr.msk.f32.mxu0 %vm4529_vm1, %v4528_v11 }
0x1596   :  { %v2519_v37 = vmul.f32 %v4503_v35, %v4499_v23  ;;  %4268 = vmatprep.subr.mxu0 %v4528_v11 }
0x1598   :  { %4256 = vmatmul.mubr.msk.f32.vlgmr.msra.gmra.mrb[32].mxu1 %vm183_vm2, %v2519_v37  ;;  %4261 = vmatmul.mubr.msk.f32.vlgmr.msra.gmra.mrb[24].mxu0 %vm183_vm2, %v2673_v38 }
0x1599   :  { %4264 = vmatpush3.xpose.msk.msra.mxu1 %vm183_vm2, %v2753_v29  ;;  %4265 = vmatprep.mubr.msk.f32.mxu1 %vm4529_vm1, %v4528_v11 }
0x159a   :  { %4273 = vmatprep.subr.mxu1 %v4528_v11  ;;  %4270 = vmatprep.mubr.msk.f32.mxu0 %vm4529_vm1, %v4528_v11 }
0x159c   :  { %4266 = vmatmul.mubr.msk.f32.vlgmr.msra.gmra.mrb[34].mxu1 %vm183_vm2, %v2751_v39 }
0x159d   :  { %4275 = vmatprep.mubr.msk.f32.mxu1 %vm4529_vm1, %v4528_v11 }
0x1667   :  { %v5055_v40 = vpop.f32.mrb[22].mxu0 }
0x1668   :  { %v4252_v41 = vpop.f32.mrb[23].mxu0 }
0x166b   :  { %v5057_v42 = vpop.f32.mrb[32].mxu1  ;;  %v2746_v43 = vpop.f32.mrb[24].mxu0 }
0x166c   :  { %v4257_v44 = vpop.f32.mrb[33].mxu1  ;;  %v4262_v45 = vpop.f32.mrb[25].mxu0  ;;  %v2828_v46 = vsel %vm2167_vm6, %v2746_v43, -inf }
0x166d   :  { %2829 = vmax.xlane.f32.xlu1 %v2828_v46  ;;  %v3893_v45 = vld [vmem:[%s5246_s5 + $0x30] sm:$0xff]  ;;  %v3894_v46 = vld [vmem:[%s5246_s5 + $0x38] sm:$0xff] }
0x166f   :  { %v2824_v47 = vpop.f32.mrb[34].mxu1 }
0x1670   :  { %v4267_v48 = vpop.f32.mrb[35].mxu1  ;;  %v2831_v49 = vsel %vm2167_vm6, %v2824_v47, -inf }
0x1671   :  { %2832 = vmax.xlane.f32.xlu0 %v2831_v49 }
0x167e   :  { %2926 = vrot.lane.b32.xlu1 %v4957_v31, %s5282_s27 }
0x1682   :  { %3082 = vrot.lane.b32.xlu1 %v4957_v31, %s5283_s3 }
0x1686   :  { %3004 = vrot.lane.b32.xlu1 %v4959_v32, %s5283_s3 }
0x1687   :  { %2850 = vrot.lane.b32.xlu0 %v4959_v32, %s5282_s27 }
0x168a   :  { %3002 = vrot.lane.b32.xlu1 %v4967_v34, %s5284_s2 }
0x16fa   :  { %v2830_v50 = vpop.xlane.xlu1 %2829 }
0x16fb   :  { %v2834_v51 = vsub.f32 %v2746_v43, %v2830_v50  ;;  %v4544_v43 = vmov 0.0|0.0  }
0x16fd   :  { %v2836_v52 = vmul.f32 1.442695, %v2834_v51 }
0x16fe   :  { %v2927_v54 = vpop.permute.xlu1 %2926  ;;  %v2833_v53 = vpop.xlane.xlu0 %2832 }
0x16ff   :  { %4504 = vpow2.f32 %v2836_v52  ;;  %v2835_v55 = vsub.f32 %v2824_v47, %v2833_v53  ;;  %4274 = vmatpush3.msra.mxu1 %v2927_v54  ;;  %v4402_v47 = vpack.c.bf16 %v3894_v46, %v3893_v45 }
0x1700   :  { %4283 = vmatprep.subr.mxu1 %v4528_v11 }
0x1701   :  { %v2838_v57 = vmul.f32 1.442695, %v2835_v55 }
0x1702   :  { %v2851_v58 = vpop.permute.xlu0 %2850  ;;  %v3083_v63 = vpop.permute.xlu1 %3082 }
0x1703   :  { %4506 = vpow2.f32 %v2838_v57  ;;  %4269 = vmatpush3.msra.mxu0 %v2851_v58 }
0x1704   :  { %4278 = vmatprep.subr.mxu0 %v4528_v11 }
0x1706   :  { %v3005_v2 = vpop.permute.xlu1 %3004 }
0x1709   :  { %v4505_v59 = vpop.eup %4504 }
0x170a   :  { %v2840_v60 = vsel %vm2167_vm6, %v4505_v59, 0.0 }
0x170b   :  { %2841 = vadd.xlane.f32.xlu0 %v2840_v60 }
0x170d   :  { %v4507_v34 = vpop.eup %4506 }
0x170e   :  { %v2843_v56 = vsel %vm2167_vm6, %v4507_v34, 0.0 }
0x170f   :  { %2844 = vadd.xlane.f32.xlu0 %v2843_v56 }
0x1725   :  { %3080 = vrot.lane.b32.xlu0 %v4976_v36, %s5284_s2  ;;  %v3003_v36 = vpop.permute.xlu1 %3002 }
0x1798   :  { %v2842_v61 = vpop.xlane.xlu0 %2841 }
0x1799   :  { %4508 = vrcp.f32 %v2842_v61 }
0x179c   :  { %v2845_v62 = vpop.xlane.xlu0 %2844 }
0x179d   :  { %4510 = vrcp.f32 %v2845_v62 }
0x17a0   :  { %v3081_v10 = vpop.permute.xlu0 %3080 }
0x17a3   :  { %v4509_v0 = vpop.eup %4508 }
0x17a4   :  { %v2848_v4 = vmul.f32 %v4509_v0, %v4505_v59 }
0x17a6   :  { %4271 = vmatmul.mubr.msk.f32.vlgmr.msra.gmra.mrb[26].mxu0 %vm183_vm2, %v2848_v4 }
0x17a7   :  { %v4511_v5 = vpop.eup %4510  ;;  %4279 = vmatpush3.xpose.msk.msra.mxu0 %vm183_vm2, %v3005_v2  ;;  %4280 = vmatprep.mubr.msk.f32.mxu0 %vm4529_vm1, %v4528_v11 }
0x17a8   :  { %v2849_v6 = vmul.f32 %v4511_v5, %v4507_v34  ;;  %4288 = vmatprep.subr.mxu0 %v4528_v11 }
0x17aa   :  { %4276 = vmatmul.mubr.msk.f32.vlgmr.msra.gmra.mrb[36].mxu1 %vm183_vm2, %v2849_v6  ;;  %4281 = vmatmul.mubr.msk.f32.vlgmr.msra.gmra.mrb[28].mxu0 %vm183_vm2, %v3003_v36 }
0x17ab   :  { %4284 = vmatpush3.xpose.msk.msra.mxu1 %vm183_vm2, %v3083_v63  ;;  %4285 = vmatprep.mubr.msk.f32.mxu1 %vm4529_vm1, %v4528_v11 }
0x17ac   :  { %4293 = vmatprep.subr.mxu1 %v4528_v11  ;;  %4290 = vmatprep.mubr.msk.f32.mxu0 %vm4529_vm1, %v4528_v11 }
0x17ae   :  { %4286 = vmatmul.mubr.msk.f32.vlgmr.msra.gmra.mrb[38].mxu1 %vm183_vm2, %v3081_v10 }
0x17af   :  { %4295 = vmatprep.mubr.msk.f32.mxu1 %vm4529_vm1, %v4528_v11 }
0x1879   :  { %v2922_v8 = vpop.f32.mrb[26].mxu0 }
0x187a   :  { %v4272_v7 = vpop.f32.mrb[27].mxu0 }
0x187d   :  { %v2998_v9 = vpop.f32.mrb[36].mxu1  ;;  %v3076_v12 = vpop.f32.mrb[28].mxu0 }
0x187e   :  { %v4277_v13 = vpop.f32.mrb[37].mxu1  ;;  %v4282_v19 = vpop.f32.mrb[29].mxu0  ;;  %v3158_v14 = vsel %vm2167_vm6, %v3076_v12, -inf }
0x187f   :  { %3159 = vmax.xlane.f32.xlu1 %v3158_v14 }
0x1881   :  { %v3154_v17 = vpop.f32.mrb[38].mxu1 }
0x1882   :  { %v4287_v18 = vpop.f32.mrb[39].mxu1  ;;  %v3161_v20 = vsel %vm2167_vm6, %v3154_v17, -inf }
0x1883   :  { %3162 = vmax.xlane.f32.xlu0 %v3161_v20 }
0x1890   :  { %3256 = vrot.lane.b32.xlu1 %v4957_v31, %s5285_s30 }
0x1894   :  { %3336 = vrot.lane.b32.xlu1 %v5057_v42, %s5286_s18  ;;  %v3892_v42 = vld [vmem:[%s5246_s5 + $0x28] sm:$0xff] }
0x1898   :  { %3344 = vrot.lane.b32.xlu1 %v2998_v9, %s5287_s0 }
0x190c   :  { %v3160_v21 = vpop.xlane.xlu1 %3159 }
0x190d   :  { %v3164_v15 = vsub.f32 %v3076_v12, %v3160_v21 }
0x190f   :  { %v3166_v22 = vmul.f32 1.442695, %v3164_v15 }
0x1910   :  { %v3257_v23 = vpop.permute.xlu1 %3256  ;;  %v3163_v24 = vpop.xlane.xlu0 %3162 }
0x1911   :  { %4512 = vpow2.f32 %v3166_v22  ;;  %v3165_v25 = vsub.f32 %v3154_v17, %v3163_v24  ;;  %4294 = vmatpush3.msra.mxu1 %v3257_v23  ;;  %v3898_v23 = vld [vmem:[%s5248_s9 + $0x20] sm:$0xff]  ;;  %v3899_v24 = vld [vmem:[%s5248_s9 + $0x28] sm:$0xff] }
0x1912   :  { %4404 = vmatprep.subr.bf16.mxu1 %v4544_v43 }
0x1913   :  { %v3168_v26 = vmul.f32 1.442695, %v3165_v25  ;;  %v4405_v25 = vpack.c.bf16 %v3899_v24, %v3898_v23 }
0x1914   :  { %v3337_v52 = vpop.permute.xlu1 %3336 }
0x1915   :  { %4514 = vpow2.f32 %v3168_v26  ;;  %v3357_v55 = vsel %vm183_vm2, %v5019_v3, %v3337_v52  ;;  %v3941_v3 = vld [vmem:[%s5247_s6 + $0x1] ss:$0 sm:$0xff]  ;;  %v3900_v26 = vld [vmem:[%s5248_s9 + $0x30] sm:$0xff] }
0x1918   :  { %v3345_v53 = vpop.permute.xlu1 %3344 }
0x1919   :  { %v3359_v57 = vsel %vm1525_vm4, %v3357_v55, %v3345_v53 }
0x191b   :  { %v4513_v29 = vpop.eup %4512 }
0x191c   :  { %v3170_v30 = vsel %vm2167_vm6, %v4513_v29, 0.0 }
0x191d   :  { %3171 = vadd.xlane.f32.xlu0 %v3170_v30 }
0x191f   :  { %v4515_v31 = vpop.eup %4514 }
0x1920   :  { %v3173_v16 = vsel %vm2167_vm6, %v4515_v31, 0.0 }
0x1921   :  { %3174 = vadd.xlane.f32.xlu0 %v3173_v16  ;;  %v3904_v16 = vld [vmem:[%s5249_s11 + $0x48] sm:$0xff] }
0x1937   :  { %3180 = vrot.lane.b32.xlu0 %v4959_v32, %s5285_s30 }
0x193b   :  { %3334 = vrot.lane.b32.xlu0 %v5055_v40, %s5286_s18  ;;  %v3891_v40 = vld [vmem:[%s5246_s5 + $0x20] sm:$0xff] }
0x193c   :  { %v4399_v44 = vpack.c.bf16 %v3892_v42, %v3891_v40 }
0x193f   :  { %3342 = vrot.lane.b32.xlu0 %v2922_v8, %s5287_s0 }
0x19aa   :  { %v3172_v33 = vpop.xlane.xlu0 %3171 }
0x19ab   :  { %4516 = vrcp.f32 %v3172_v33  ;;  %v3905_v33 = vld [vmem:[%s5249_s11 + $0x50] sm:$0xff] }
0x19ae   :  { %v3175_v35 = vpop.xlane.xlu0 %3174 }
0x19af   :  { %4518 = vrcp.f32 %v3175_v35 }
0x19b2   :  { %v3181_v37 = vpop.permute.xlu0 %3180 }
0x19b3   :  { %4289 = vmatpush3.msra.mxu0 %v3181_v37  ;;  %v3906_v37 = vld [vmem:[%s5249_s11 + $0x58] sm:$0xff] }
0x19b4   :  { %4398 = vmatprep.subr.bf16.mxu0 %v4544_v43 }
0x19b5   :  { %v4517_v38 = vpop.eup %4516 }
0x19b6   :  { %v3178_v39 = vmul.f32 %v4517_v38, %v4513_v29  ;;  %v3335_v54 = vpop.permute.xlu0 %3334  ;;  %v3901_v29 = vld [vmem:[%s5248_s9 + $0x38] sm:$0xff]  ;;  %v4414_v38 = vpack.c.bf16 %v3906_v37, %v3905_v33 }
0x19b7   :  { %v3356_v34 = vsel %vm183_vm2, %v5017_v1, %v3335_v54  ;;  %v4408_v30 = vpack.c.bf16 %v3901_v29, %v3900_v26  ;;  %v3944_v54 = vld [vmem:[%s5251_s8 + $0x1] ss:$0 sm:$0xff]  ;;  %v3749_v29 = vld [vmem:[%s5256_s15 + $0x8] sm:$0xff] }
0x19b8   :  { %4291 = vmatmul.mubr.msk.f32.vlgmr.msra.gmra.mrb[30].mxu0 %vm183_vm2, %v3178_v39  ;;  %v3907_v39 = vld [vmem:[%s5249_s11 + $0x60] sm:$0xff] }
0x19b9   :  { %v4519_v41 = vpop.eup %4518  ;;  %4306 = vmatprep.mubr.msk.f32.mxu0 %vm4529_vm1, %v4528_v11  ;;  %4400 = vmatpush3.bf16.msra.mxu0 %v4399_v44  ;;  %v3748_v26 = vld [vmem:[%s5256_s15] sm:$0xff] }
0x19ba   :  { %v3179_v32 = vmul.f32 %v4519_v41, %v4515_v31  ;;  %4401 = vmatprep.subr.bf16.mxu0 %v4544_v43  ;;  %v3343_v59 = vpop.permute.xlu0 %3342  ;;  %v3903_v31 = vld [vmem:[%s5249_s11 + $0x40] sm:$0xff]  ;;  %v3908_v41 = vld [vmem:[%s5249_s11 + $0x68] sm:$0xff] }
0x19bb   :  { %v3358_v56 = vsel %vm1525_vm4, %v3356_v34, %v3343_v59  ;;  %v4411_v35 = vpack.c.bf16 %v3904_v16, %v3903_v31  ;;  %v3750_v31 = vld [vmem:[%s5256_s15 + $0x10] sm:$0xff]  ;;  %v3751_v16 = vld [vmem:[%s5256_s15 + $0x18] sm:$0xff] }
0x19bc   :  { %4296 = vmatmul.mubr.msk.f32.vlgmr.msra.gmra.mrb[40].mxu1 %vm183_vm2, %v3179_v32  ;;  %v4417_v32 = vpack.c.bf16 %v3908_v41, %v3907_v39  ;;  %v4426_v33 = vpack.c.bf16 %v3751_v16, %v3750_v31 }
0x19bd   :  { %4317 = vmatprep.mubr.msk.f32.mxu1 %vm4529_vm1, %v4528_v11  ;;  %4403 = vmatpush3.bf16.msra.mxu0 %v4402_v47 }
0x19be   :  { %4410 = vmatprep.subr.bf16.mxu0 %v4544_v43  ;;  %4406 = vmatpush3.bf16.msra.mxu1 %v4405_v25 }
0x19bf   :  { %4407 = vmatprep.subr.bf16.mxu1 %v4544_v43 }
0x19c2   :  { %4409 = vmatpush3.bf16.msra.mxu1 %v4408_v30  ;;  %v4423_v30 = vpack.c.bf16 %v3749_v29, %v3748_v26 }
0x19c3   :  { %4422 = vmatprep.subr.bf16.mxu1 %v4544_v43 }
0x1a8b   :  { %v3252_v48 = vpop.f32.mrb[30].mxu0 }
0x1a8c   :  { %v4292_v49 = vpop.f32.mrb[31].mxu0 }
0x1a8f   :  { %v3328_v50 = vpop.f32.mrb[40].mxu1 }
0x1a90   :  { %3352 = vrot.lane.b32.xlu1 %v3328_v50, %s5288_s1  ;;  %v4297_v51 = vpop.f32.mrb[41].mxu1  ;;  %v3943_v50 = vld [vmem:[%s5250_s7 + $0x1] ss:$0 sm:$0xff] }
0x1a94   :  { %3350 = vrot.lane.b32.xlu1 %v3252_v48, %s5288_s1 }
0x1b02   :  { %v3353_v58 = vpop.permute.xlu1 %3352 }
0x1b03   :  { %v3361_v60 = vsel %vm1528_vm3, %v3359_v57, %v3353_v58 }
0x1b04   :  { %v3370_v61 = vrot.slane %v3361_v60, 7 }
0x1b06   :  { %v3351_v62 = vpop.permute.xlu1 %3350 }
0x1b07   :  { %v3360_v63 = vsel %vm1528_vm3, %v3358_v56, %v3351_v62  ;;  %v3910_v62 = vld [vmem:[%s5249_s11 + $0x78] sm:$0xff] }
0x1b08   :  { %v3372_v0 = vsel %vm3371_vm7, %v3370_v61, %v3360_v63  ;;  %v3909_v61 = vld [vmem:[%s5249_s11 + $0x70] sm:$0xff] }
0x1b09   :  { %4307 = vmatmul.mubr.msk.f32.vlgmr.msra.gmra.mrb[32].mxu0 %vm98_vm0, %v3372_v0  ;;  %v4420_v63 = vpack.c.bf16 %v3910_v62, %v3909_v61  ;;  %v3945_v0 = vld [vmem:[%s5252_s10 + $0x1] ss:$0 sm:$0xff] }
0x1b0a   :  { %4336 = vmatprep.mubr.msk.f32.mxu0 %vm4529_vm1, %v4528_v11  ;;  %4412 = vmatpush3.bf16.msra.mxu0 %v4411_v35  ;;  %v22_v35 = vstv %s5257_s16 }
0x1b0b   :  { %4413 = vmatprep.subr.bf16.mxu0 %v4544_v43  ;;  %23 = vst [vmem:[#allocation2] sm:$0x1] %v22_v35 }
0x1b0e   :  { %4415 = vmatpush3.bf16.msra.mxu0 %v4414_v38 }
0x1b0f   :  { %4416 = vmatprep.subr.bf16.mxu0 %v4544_v43 }
0x1b12   :  { %4418 = vmatpush3.bf16.msra.mxu0 %v4417_v32 }
0x1b13   :  { %4419 = vmatprep.subr.bf16.mxu0 %v4544_v43 }
0x1b16   :  { %4421 = vmatpush3.bf16.msra.mxu0 %v4420_v63 }
0x1bdc   :  { %v3441_v2 = vpop.f32.mrb[32].mxu0 }
0x1bdd   :  { %v3442_v1 = vadd.f32 %v3941_v3, %v3441_v2  ;;  %v4308_v4 = vpop.f32.mrb[33].mxu0 }
0x1bdf   :  { %v3446_v5 = vrot.slane %v3442_v1, 1  ;;  %v3447_v6 = vrot.slane %v3442_v1, 2 }
0x1be1   :  { %v3450_v36 = vadd.f32 %v3446_v5, %v4944_v27  ;;  %v3451_v10 = vadd.f32 %v3447_v6, %v4946_v28 }
0x1be3   :  { %v3458_v8 = vsel %vm3457_vm8, %v3450_v36, 0.0  ;;  %v3454_v7 = vrot.slane %v3451_v10, 7 }
0x1be4   :  { %3459 = vadd.xlane.f32.xlu1 %v3458_v8 }
0x1be5   :  { %v3462_v9 = vsel %vm3461_vm9, %v3454_v7, 0.0 }
0x1be6   :  { %3463 = vadd.xlane.f32.xlu0 %v3462_v9 }
0x1c71   :  { %v3460_v12 = vpop.xlane.xlu1 %3459 }
0x1c72   :  { %v3465_v14 = vmul.f32 0.03125, %v3460_v12 }
0x1c73   :  { %v3464_v13 = vpop.xlane.xlu0 %3463 }
0x1c74   :  { %v3466_v19 = vmul.f32 0.03125, %v3464_v13  ;;  %v3472_v20 = vsub.f32 %v3450_v36, %v3465_v14 }
0x1c76   :  { %v3469_v17 = vrot.slane %v3466_v19, 1  ;;  %v3474_v28 = vmul.f32 %v3472_v20, %v3472_v20 }
0x1c78   :  { %v3473_v18 = vsub.f32 %v3451_v10, %v3469_v17  ;;  %v3481_v22 = vsel %vm3457_vm8, %v3474_v28, 0.0 }
0x1c7a   :  { %v3475_v21 = vmul.f32 %v3473_v18, %v3473_v18 }
0x1c7c   :  { %v3478_v15 = vrot.slane %v3475_v21, 7 }
0x1c7e   :  { %v3484_v27 = vsel %vm3461_vm9, %v3478_v15, 0.0 }
0x1c7f   :  { %3485 = vadd.xlane.f32.xlu0 %v3484_v27 }
0x1c83   :  { %3482 = vadd.xlane.f32.xlu0 %v3481_v22 }
0x1d0c   :  { %v3486_v40 = vpop.xlane.xlu0 %3485 }
0x1d0d   :  { %v3488_v42 = vmul.f32 0.03125, %v3486_v40 }
0x1d0f   :  { %v3490_v44 = vadd.f32 1e-05, %v3488_v42 }
0x1d10   :  { %v3483_v45 = vpop.xlane.xlu0 %3482 }
0x1d11   :  { %4520 = vrsqrt.f32 %v3490_v44  ;;  %v3487_v46 = vmul.f32 0.03125, %v3483_v45  ;;  %v3949_v44 = vld [vmem:[%s5254_s13 + $0x1] ss:$0 sm:$0xff] }
0x1d13   :  { %v3489_v47 = vadd.f32 1e-05, %v3487_v46 }
0x1d15   :  { %4522 = vrsqrt.f32 %v3489_v47 }
0x1d1b   :  { %v4521_v48 = vpop.eup %4520 }
0x1d1c   :  { %v3495_v49 = vrot.slane %v4521_v48, 1  ;;  %v3950_v48 = vld [vmem:[%s5255_s14 + $0x1] ss:$0 sm:$0xff] }
0x1d1e   :  { %v3499_v51 = vmul.f32 %v3495_v49, %v3473_v18 }
0x1d1f   :  { %v4523_v52 = vpop.eup %4522 }
0x1d20   :  { %v3507_v53 = vmul.f32 %v3943_v50, %v3499_v51  ;;  %v3498_v55 = vmul.f32 %v4523_v52, %v3472_v20 }
0x1d22   :  { %v3515_v57 = vadd.f32 %v3944_v54, %v3507_v53  ;;  %v3506_v58 = vmul.f32 %v3943_v50, %v3498_v55 }
0x1d24   :  { %v3514_v59 = vadd.f32 %v3944_v54, %v3506_v58  ;;  %v3525_v34 = vrot.slane %v3515_v57, 6  ;;  %v3951_v58 = vld [vmem:[#allocation2] ss:$0 sm:$0xff] }
0x1d26   :  { %v3524_v60 = vrot.slane %v3514_v59, 7 }
0x1d28   :  { %v3526_v56 = vsel %vm3371_vm7, %v3525_v34, %v3524_v60 }
0x1d29   :  { %4318 = vmatmul.mubr.msk.f32.vlgmr.msra.gmra.mrb[42].mxu1 %vm98_vm0, %v3526_v56 }
0x1d2a   :  { %4347 = vmatprep.mubr.msk.f32.mxu1 %vm4529_vm1, %v4528_v11  ;;  %v3947_v11 = vld [vmem:[%s5253_s12 + $0x1] ss:$0 sm:$0xff]  ;;  %4424 = vmatpush3.bf16.msra.mxu1 %v4423_v30 }
0x1d2b   :  { %4425 = vmatprep.subr.bf16.mxu1 %v4544_v43 }
0x1d2e   :  { %4427 = vmatpush3.bf16.msra.mxu1 %v4426_v33 }
0x1dfc   :  { %v3595_v3 = vpop.f32.mrb[42].mxu1 }
0x1dfd   :  { %v3596_v2 = vadd.f32 %v3945_v0, %v3595_v3  ;;  %v4319_v1 = vpop.f32.mrb[43].mxu1 }
0x1dff   :  { %v3599_v4 = vmax.f32 %v3596_v2, 0.0 }
0x1e01   :  { %4337 = vmatmul.mubr.msk.f32.vlgmr.msra.gmra.mrb[34].mxu0 %vm1758_vm5, %v3599_v4 }
0x1ed4   :  { %v3675_v5 = vpop.f32.mrb[34].mxu0 }
0x1ed5   :  { %v3676_v6 = vadd.f32 %v3947_v11, %v3675_v5  ;;  %v4338_v36 = vpop.f32.mrb[35].mxu0 }
0x1ed7   :  { %v3680_v10 = vrot.slane %v3676_v6, 1  ;;  %v3681_v8 = vrot.slane %v3676_v6, 2 }
0x1ed9   :  { %v3685_v7 = vadd.f32 %v3681_v8, %v3515_v57  ;;  %v3684_v9 = vadd.f32 %v3680_v10, %v3514_v59  ;;  %v4545_v57 = vmov 0  }
0x1eda   :  { %4446 = vset.pattern.permute.xlu1 %v4545_v57  ;;  %4447 = vset.pattern.permute.xlu0 %v4545_v57 }
0x1edb   :  { %v3691_v12 = vsel %vm3457_vm8, %v3684_v9, 0.0  ;;  %v3688_v13 = vrot.slane %v3685_v7, 7 }
0x1edc   :  { %3692 = vadd.xlane.f32.xlu0 %v3691_v12 }
0x1edd   :  { %v3694_v19 = vsel %vm3461_vm9, %v3688_v13, 0.0 }
0x1ede   :  { %3695 = vadd.xlane.f32.xlu1 %v3694_v19 }
0x1f69   :  { %v3693_v14 = vpop.xlane.xlu0 %3692 }
0x1f6a   :  { %v3697_v17 = vmul.f32 0.03125, %v3693_v14 }
0x1f6b   :  { %v3696_v18 = vpop.xlane.xlu1 %3695 }
0x1f6c   :  { %v3704_v20 = vsub.f32 %v3684_v9, %v3697_v17  ;;  %v3698_v21 = vmul.f32 0.03125, %v3696_v18 }
0x1f6e   :  { %v3701_v15 = vrot.slane %v3698_v21, 1  ;;  %v3706_v27 = vmul.f32 %v3704_v20, %v3704_v20 }
0x1f70   :  { %v3705_v28 = vsub.f32 %v3685_v7, %v3701_v15  ;;  %v3713_v22 = vsel %vm3457_vm8, %v3706_v27, 0.0 }
0x1f71   :  { %3714 = vadd.xlane.f32.xlu0 %v3713_v22 }
0x1f72   :  { %v3707_v23 = vmul.f32 %v3705_v28, %v3705_v28 }
0x1f74   :  { %v3710_v24 = vrot.slane %v3707_v23, 7 }
0x1f76   :  { %v3716_v25 = vsel %vm3461_vm9, %v3710_v24, 0.0 }
0x1f77   :  { %3717 = vadd.xlane.f32.xlu1 %v3716_v25 }
0x1ffe   :  { %v3715_v37 = vpop.xlane.xlu0 %3714 }
0x1fff   :  { %v3719_v38 = vmul.f32 0.03125, %v3715_v37 }
0x2001   :  { %v3721_v39 = vadd.f32 1e-05, %v3719_v38 }
0x2003   :  { %4524 = vrsqrt.f32 %v3721_v39 }
0x2004   :  { %v3718_v43 = vpop.xlane.xlu1 %3717 }
0x2005   :  { %v3720_v41 = vmul.f32 0.03125, %v3718_v43 }
0x2007   :  { %v3722_v32 = vadd.f32 1e-05, %v3720_v41 }
0x2009   :  { %4526 = vrsqrt.f32 %v3722_v32 }
0x200d   :  { %v4525_v40 = vpop.eup %4524 }
0x200e   :  { %v3730_v42 = vmul.f32 %v4525_v40, %v3704_v20 }
0x2010   :  { %v3738_v47 = vmul.f32 %v3949_v44, %v3730_v42 }
0x2012   :  { %v3746_v51 = vadd.f32 %v3950_v48, %v3738_v47 }
0x2013   :  { %v4527_v45 = vpop.eup %4526 }
0x2014   :  { %v3727_v46 = vrot.slane %v4527_v45, 1  ;;  %v3761_v54 = vrot.slane %v3746_v51, 7 }
0x2016   :  { %v3731_v49 = vmul.f32 %v3727_v46, %v3705_v28 }
0x2018   :  { %v3739_v50 = vmul.f32 %v3949_v44, %v3731_v49 }
0x201a   :  { %v3747_v52 = vadd.f32 %v3950_v48, %v3739_v50 }
0x201c   :  { %v3762_v53 = vrot.slane %v3747_v52, 6 }
0x201e   :  { %v3763_v55 = vsel %vm3371_vm7, %v3762_v53, %v3761_v54 }
0x201f   :  { %4348 = vmatmul.mubr.msk.f32.vlgmr.msra.gmra.mrb[44].mxu1 %vm98_vm0, %v3763_v55 }
0x20f2   :  { %v3832_v59 = vpop.f32.mrb[44].mxu1 }
0x20f3   :  { %v3833_v60 = vadd.f32 %v3951_v58, %v3832_v59  ;;  %v4349_v34 = vpop.f32.mrb[45].mxu1 }
0x20f5   :  { %3838 = vperm.xlu1 %4446, %v3833_v60  }
0x2174   :  { %v3839_v56 = vpop.permute.xlu1 %3838 }
0x2175   :  { %3841 = vst [vmem:[%s5258_s17] sm:$0x3] %v3839_v56 }

</bundles_post_ra>
